<compile_context>
chip_gen: v7x
topology: tpu7x:2x2x1
jax: 0.10.0
libtpu: 0.0.40
codegen_flags: <defaults>
</compile_context>

<pallas_src>
import jax
import jax.numpy as jnp
from jax.experimental import pallas as pl
from jax.experimental.pallas import tpu as pltpu


def cnet_kernel(x_ref, w1_ref, b1_ref, w2_ref, b2_ref, w3_ref, b3_ref,
                w4_ref, b4_ref, o_ref):
    # Layer 1: Linear(F, N)  -- no ReLU after this one.
    x = x_ref[...].astype(jnp.bfloat16)
    h = jnp.dot(x, w1_ref[...], preferred_element_type=jnp.float32) + b1_ref[...]

    # Layer 2: Linear(N, N) + ReLU   (bf16 MXU operands, f32 accumulate)
    h = jnp.dot(h.astype(jnp.bfloat16), w2_ref[...],
                preferred_element_type=jnp.float32) + b2_ref[...]
    h = jnp.maximum(h, 0.0)

    # Layer 3: Linear(N, N) + ReLU
    h = jnp.dot(h.astype(jnp.bfloat16), w3_ref[...],
                preferred_element_type=jnp.float32) + b3_ref[...]
    h = jnp.maximum(h, 0.0)

    # Layer 4: Linear(N, 1).  An N=1 matmul wastes almost all MXU columns, so do
    # it as a VPU multiply + lane reduction (f32), w4 is passed as a (1, N) row.
    out = jnp.sum(h * w4_ref[...], axis=-1, keepdims=True) + b4_ref[...]

    o_ref[...] = jax.nn.sigmoid(out).astype(o_ref.dtype)


def _pick_block_b(batch):
    """Large batch tiles keep MXU rows full; keep >= 2 grid steps so v7x's two
    TensorCores are both used (the batch axis is the 'parallel' one), and obey
    the sublane-of-8 block rule (or block == full array)."""
    if batch <= 8:
        return batch                  # full-array block
    if batch <= 16:
        return 8                      # 2 grid steps
    blk = min(512, batch // 2)        # at least 2 grid steps, at most 512 rows
    return max(8, (blk // 8) * 8)


def cnet_forward(x, params, *, block_b=None):
    B, F = x.shape
    w1, b1, w2, b2, w3, b3, w4, b4 = params
    N = w1.shape[1]

    # bf16 matmul operands at the call boundary; biases and the final (tiny)
    # layer stay f32 so all VPU/EUP work is f32 on every generation.
    bf16 = jnp.bfloat16
    w1b = w1.astype(bf16)
    w2b = w2.astype(bf16)
    w3b = w3.astype(bf16)
    w4_row = w4.reshape(1, N).astype(jnp.float32)   # lane-major row for the VPU dot
    b4_ = b4.reshape(1, 1).astype(jnp.float32)

    if block_b is None:
        block_b = _pick_block_b(B)
    grid = (pl.cdiv(B, block_b),)

    resident = (w1b, b1, w2b, b2, w3b, b3, w4_row, b4_)
    resident_bytes = sum(int(a.size) * a.dtype.itemsize for a in resident)

    # VMEM budget: double-buffered weights + streamed x/out tiles + a few live
    # (block_b, N) f32 intermediates, plus headroom.  Only ever raise the scoped
    # limit above the per-generation default; stay below v7x's 64 MiB physical.
    tile_io_bytes = 2 * (block_b * F * x.dtype.itemsize + block_b * 4)
    live_act_bytes = 4 * block_b * N * 4
    vmem_est = 2 * resident_bytes + tile_io_bytes + live_act_bytes + (4 << 20)
    vmem_limit = int(min(max(vmem_est, 32 << 20), 56 << 20))

    cost = pl.CostEstimate(
        flops=2 * B * (F * N + N * N + N * N + N),
        transcendentals=B,  # sigmoid
        bytes_accessed=int(resident_bytes + x.size * x.dtype.itemsize + B * 4),
    )

    def _full(a):
        # whole-array block, same block index at every grid step -> Pallas keeps
        # it resident and does not re-DMA it.  (pipeline_mode=pl.Buffered(1)
        # would also halve its buffer footprint; only matters if N >> 512.)
        return pl.BlockSpec(a.shape, lambda i: (0, 0))

    return pl.pallas_call(
        cnet_kernel,
        out_shape=jax.ShapeDtypeStruct((B, 1), x.dtype),
        grid=grid,
        in_specs=[
            pl.BlockSpec((block_b, F), lambda i: (i, 0)),   # x: tiled over batch
            _full(w1b), _full(b1),
            _full(w2b), _full(b2),
            _full(w3b), _full(b3),
            _full(w4_row), _full(b4_),
        ],
        out_specs=pl.BlockSpec((block_b, 1), lambda i: (i, 0)),
        compiler_params=pltpu.CompilerParams(
            dimension_semantics=("parallel",),
            vmem_limit_bytes=vmem_limit,
        ),
        cost_estimate=cost,
    )(x, w1b, b1, w2b, b2, w3b, b3, w4_row, b4_)


def init_params(key, in_features, n_neurons):
    """Deterministic PyTorch-Linear-style uniform init (U(-1/sqrt(fan_in), ..))."""
    keys = jax.random.split(key, 8)

    def lin(kw, kb, fan_in, fan_out):
        bound = 1.0 / float(fan_in) ** 0.5
        w = jax.random.uniform(kw, (fan_in, fan_out), jnp.float32, -bound, bound)
        b = jax.random.uniform(kb, (1, fan_out), jnp.float32, -bound, bound)
        return w, b

    w1, b1 = lin(keys[0], keys[1], in_features, n_neurons)
    w2, b2 = lin(keys[2], keys[3], n_neurons, n_neurons)
    w3, b3 = lin(keys[4], keys[5], n_neurons, n_neurons)
    w4, b4 = lin(keys[6], keys[7], n_neurons, 1)
    return (w1, b1, w2, b2, w3, b3, w4, b4)


def cnet_reference_bf16(x, params):
    """Pure-JAX reference with the same precision strategy as the kernel."""
    w1, b1, w2, b2, w3, b3, w4, b4 = params
    bf = jnp.bfloat16
    h = jnp.dot(x.astype(bf), w1.astype(bf),
                preferred_element_type=jnp.float32) + b1
    h = jnp.maximum(jnp.dot(h.astype(bf), w2.astype(bf),
                            preferred_element_type=jnp.float32) + b2, 0.0)
    h = jnp.maximum(jnp.dot(h.astype(bf), w3.astype(bf),
                            preferred_element_type=jnp.float32) + b3, 0.0)
    out = h @ w4 + b4
    return jax.nn.sigmoid(out)


if __name__ == "__main__":
    key = jax.random.PRNGKey(0)
    in_features, n_neurons, batch = 10, 512, 256   # module-default widths

    kx, kp = jax.random.split(key)
    x = jax.random.normal(kx, (batch, in_features), jnp.float32)
    params = init_params(kp, in_features, n_neurons)

    out = jax.block_until_ready(cnet_forward(x, params))
    assert out.shape == (batch, 1), out.shape

    # Matched-precision reference (bf16 matmul operands, f32 accumulation).
    ref = cnet_reference_bf16(x, params)
    assert jnp.allclose(out, ref, atol=1e-3, rtol=1e-3), "mismatch vs bf16 reference"

    # Loose sanity check vs full-f32 math (bf16 operands => ~1e-2-level error).
    w1, b1, w2, b2, w3, b3, w4, b4 = params
    h = x @ w1 + b1
    h = jnp.maximum(h @ w2 + b2, 0.0)
    h = jnp.maximum(h @ w3 + b3, 0.0)
    ref_f32 = jax.nn.sigmoid(h @ w4 + b4)
    assert jnp.allclose(out, ref_f32, atol=5e-2), "mismatch vs f32 reference"

    print("KERNEL_OK")
</pallas_src>

<mosaic_0001>
module attributes {stable_mosaic.version = 11 : i64} {
  func.func @cnet_kernel(%arg0: i32, %arg1: memref<128x10xf32, #tpu.memory_space<vmem>>, %arg2: memref<10x512xbf16, #tpu.memory_space<vmem>>, %arg3: memref<1x512xf32, #tpu.memory_space<vmem>>, %arg4: memref<512x512xbf16, #tpu.memory_space<vmem>>, %arg5: memref<1x512xf32, #tpu.memory_space<vmem>>, %arg6: memref<512x512xbf16, #tpu.memory_space<vmem>>, %arg7: memref<1x512xf32, #tpu.memory_space<vmem>>, %arg8: memref<1x512xf32, #tpu.memory_space<vmem>>, %arg9: memref<1x1xf32, #tpu.memory_space<vmem>>, %arg10: memref<128x1xf32, #tpu.memory_space<vmem>>) attributes {dimension_semantics = [#tpu.dimension_semantics<parallel>], iteration_bounds = array<i64: 2>, scalar_prefetch = 0 : i64, scratch_operands = 0 : i64, tpu.core_type = #tpu.core_type<tc>, window_params = [{transform_indices = @transform_0, window_bounds = array<i64: 128, 10>}, {pipeline_mode = #tpu.pipeline_mode<synchronous>, transform_indices = @transform_1, window_bounds = array<i64: 10, 512>}, {pipeline_mode = #tpu.pipeline_mode<synchronous>, transform_indices = @transform_2, window_bounds = array<i64: 1, 512>}, {pipeline_mode = #tpu.pipeline_mode<synchronous>, transform_indices = @transform_3, window_bounds = array<i64: 512, 512>}, {pipeline_mode = #tpu.pipeline_mode<synchronous>, transform_indices = @transform_4, window_bounds = array<i64: 1, 512>}, {pipeline_mode = #tpu.pipeline_mode<synchronous>, transform_indices = @transform_5, window_bounds = array<i64: 512, 512>}, {pipeline_mode = #tpu.pipeline_mode<synchronous>, transform_indices = @transform_6, window_bounds = array<i64: 1, 512>}, {pipeline_mode = #tpu.pipeline_mode<synchronous>, transform_indices = @transform_7, window_bounds = array<i64: 1, 512>}, {pipeline_mode = #tpu.pipeline_mode<synchronous>, transform_indices = @transform_8, window_bounds = array<i64: 1, 1>}, {transform_indices = @transform_9, window_bounds = array<i64: 128, 1>}]} {
    %c0 = arith.constant 0 : index
    %c0_0 = arith.constant 0 : index
    %0 = vector.load %arg1[%c0, %c0_0] : memref<128x10xf32, #tpu.memory_space<vmem>>, vector<128x10xf32>
    %1 = arith.truncf %0 : vector<128x10xf32> to vector<128x10xbf16>
    %c0_1 = arith.constant 0 : index
    %c0_2 = arith.constant 0 : index
    %2 = vector.load %arg2[%c0_1, %c0_2] : memref<10x512xbf16, #tpu.memory_space<vmem>>, vector<10x512xbf16>
    %cst = arith.constant dense<0.000000e+00> : vector<128x512xf32>
    %3 = tpu.matmul %1, %2, %cst {dimension_numbers = #tpu.dot_dimension_numbers<[1], [0], [0], [1], [0, 0, 1, 1], [], []>} : vector<128x10xbf16>, vector<10x512xbf16>, vector<128x512xf32> -> vector<128x512xf32>
    %c0_3 = arith.constant 0 : index
    %c0_4 = arith.constant 0 : index
    %4 = vector.load %arg3[%c0_3, %c0_4] : memref<1x512xf32, #tpu.memory_space<vmem>>, vector<1x512xf32>
    %5 = vector.broadcast %4 : vector<1x512xf32> to vector<128x512xf32>
    %6 = arith.addf %3, %5 : vector<128x512xf32>
    %7 = arith.truncf %6 : vector<128x512xf32> to vector<128x512xbf16>
    %c0_5 = arith.constant 0 : index
    %c0_6 = arith.constant 0 : index
    %8 = vector.load %arg4[%c0_5, %c0_6] : memref<512x512xbf16, #tpu.memory_space<vmem>>, vector<512x512xbf16>
    %cst_7 = arith.constant dense<0.000000e+00> : vector<128x512xf32>
    %9 = tpu.matmul %7, %8, %cst_7 {dimension_numbers = #tpu.dot_dimension_numbers<[1], [0], [0], [1], [0, 0, 1, 1], [], []>} : vector<128x512xbf16>, vector<512x512xbf16>, vector<128x512xf32> -> vector<128x512xf32>
    %c0_8 = arith.constant 0 : index
    %c0_9 = arith.constant 0 : index
    %10 = vector.load %arg5[%c0_8, %c0_9] : memref<1x512xf32, #tpu.memory_space<vmem>>, vector<1x512xf32>
    %11 = vector.broadcast %10 : vector<1x512xf32> to vector<128x512xf32>
    %12 = arith.addf %9, %11 : vector<128x512xf32>
    %cst_10 = arith.constant 0.000000e+00 : f32
    %13 = vector.broadcast %cst_10 : f32 to vector<128x512xf32>
    %14 = arith.maximumf %12, %13 : vector<128x512xf32>
    %15 = arith.truncf %14 : vector<128x512xf32> to vector<128x512xbf16>
    %c0_11 = arith.constant 0 : index
    %c0_12 = arith.constant 0 : index
    %16 = vector.load %arg6[%c0_11, %c0_12] : memref<512x512xbf16, #tpu.memory_space<vmem>>, vector<512x512xbf16>
    %cst_13 = arith.constant dense<0.000000e+00> : vector<128x512xf32>
    %17 = tpu.matmul %15, %16, %cst_13 {dimension_numbers = #tpu.dot_dimension_numbers<[1], [0], [0], [1], [0, 0, 1, 1], [], []>} : vector<128x512xbf16>, vector<512x512xbf16>, vector<128x512xf32> -> vector<128x512xf32>
    %c0_14 = arith.constant 0 : index
    %c0_15 = arith.constant 0 : index
    %18 = vector.load %arg7[%c0_14, %c0_15] : memref<1x512xf32, #tpu.memory_space<vmem>>, vector<1x512xf32>
    %19 = vector.broadcast %18 : vector<1x512xf32> to vector<128x512xf32>
    %20 = arith.addf %17, %19 : vector<128x512xf32>
    %cst_16 = arith.constant 0.000000e+00 : f32
    %21 = vector.broadcast %cst_16 : f32 to vector<128x512xf32>
    %22 = arith.maximumf %20, %21 : vector<128x512xf32>
    %c0_17 = arith.constant 0 : index
    %c0_18 = arith.constant 0 : index
    %23 = vector.load %arg8[%c0_17, %c0_18] : memref<1x512xf32, #tpu.memory_space<vmem>>, vector<1x512xf32>
    %24 = vector.broadcast %23 : vector<1x512xf32> to vector<128x512xf32>
    %25 = arith.mulf %22, %24 : vector<128x512xf32>
    %cst_19 = arith.constant dense<0.000000e+00> : vector<128xf32>
    %26 = vector.multi_reduction <add>, %25, %cst_19 [1] : vector<128x512xf32> to vector<128xf32>
    %27 = vector.shape_cast %26 : vector<128xf32> to vector<128x1xf32>
    %c0_20 = arith.constant 0 : index
    %c0_21 = arith.constant 0 : index
    %28 = vector.load %arg9[%c0_20, %c0_21] : memref<1x1xf32, #tpu.memory_space<vmem>>, vector<1x1xf32>
    %29 = vector.broadcast %28 : vector<1x1xf32> to vector<128x1xf32>
    %30 = arith.addf %27, %29 : vector<128x1xf32>
    %31 = arith.negf %30 : vector<128x1xf32>
    %32 = math.exp %31 : vector<128x1xf32>
    %cst_22 = arith.constant 1.000000e+00 : f32
    %33 = vector.broadcast %cst_22 : f32 to vector<128x1xf32>
    %34 = arith.addf %33, %32 : vector<128x1xf32>
    %35 = arith.divf %33, %34 : vector<128x1xf32>
    %c0_23 = arith.constant 0 : index
    %c0_24 = arith.constant 0 : index
    %36 = vector.load %arg10[%c0_23, %c0_24] : memref<128x1xf32, #tpu.memory_space<vmem>>, vector<128x1xf32>
    tpu.vector_store %arg10[%c0_23, %c0_24], %35 {strides = array<i32>} : memref<128x1xf32, #tpu.memory_space<vmem>>, vector<128x1xf32>,
    return
  }
  func.func @transform_0(%arg0: i32) -> (i32, i32) {
    %c0_i32 = arith.constant 0 : i32
    %c0_i32_0 = arith.constant 0 : i32
    return %arg0, %c0_i32 : i32, i32
  }
  func.func @transform_1(%arg0: i32) -> (i32, i32) {
    %c0_i32 = arith.constant 0 : i32
    %c0_i32_0 = arith.constant 0 : i32
    %c0_i32_1 = arith.constant 0 : i32
    return %c0_i32, %c0_i32_0 : i32, i32
  }
  func.func @transform_2(%arg0: i32) -> (i32, i32) {
    %c0_i32 = arith.constant 0 : i32
    %c0_i32_0 = arith.constant 0 : i32
    %c0_i32_1 = arith.constant 0 : i32
    return %c0_i32, %c0_i32_0 : i32, i32
  }
  func.func @transform_3(%arg0: i32) -> (i32, i32) {
    %c0_i32 = arith.constant 0 : i32
    %c0_i32_0 = arith.constant 0 : i32
    %c0_i32_1 = arith.constant 0 : i32
    return %c0_i32, %c0_i32_0 : i32, i32
  }
  func.func @transform_4(%arg0: i32) -> (i32, i32) {
    %c0_i32 = arith.constant 0 : i32
    %c0_i32_0 = arith.constant 0 : i32
    %c0_i32_1 = arith.constant 0 : i32
    return %c0_i32, %c0_i32_0 : i32, i32
  }
  func.func @transform_5(%arg0: i32) -> (i32, i32) {
    %c0_i32 = arith.constant 0 : i32
    %c0_i32_0 = arith.constant 0 : i32
    %c0_i32_1 = arith.constant 0 : i32
    return %c0_i32, %c0_i32_0 : i32, i32
  }
  func.func @transform_6(%arg0: i32) -> (i32, i32) {
    %c0_i32 = arith.constant 0 : i32
    %c0_i32_0 = arith.constant 0 : i32
    %c0_i32_1 = arith.constant 0 : i32
    return %c0_i32, %c0_i32_0 : i32, i32
  }
  func.func @transform_7(%arg0: i32) -> (i32, i32) {
    %c0_i32 = arith.constant 0 : i32
    %c0_i32_0 = arith.constant 0 : i32
    %c0_i32_1 = arith.constant 0 : i32
    return %c0_i32, %c0_i32_0 : i32, i32
  }
  func.func @transform_8(%arg0: i32) -> (i32, i32) {
    %c0_i32 = arith.constant 0 : i32
    %c0_i32_0 = arith.constant 0 : i32
    %c0_i32_1 = arith.constant 0 : i32
    return %c0_i32, %c0_i32_0 : i32, i32
  }
  func.func @transform_9(%arg0: i32) -> (i32, i32) {
    %c0_i32 = arith.constant 0 : i32
    %c0_i32_0 = arith.constant 0 : i32
    return %arg0, %c0_i32 : i32, i32
  }
}

</mosaic_0001>

<bundles_post_ra>
// kernel: tpu_custom_call.1
= control target key start
LH: loop header
LB: loop body
LE: loop exit
PB: predicated region body
PF: predicated region fallthrough
CT: control target
= control target key end

     0   :  { %s5602_s0 = inlined_call_operand.vmem [shape: f32[256,10], index: 0, kind: input, shape index: {}]   ;;  %s5603_s1 = inlined_call_operand.vmem [shape: bf16[10,512], index: 1, kind: input, shape index: {}]   ;;  %s5604_s2 = inlined_call_operand.vmem [shape: f32[1,512], index: 2, kind: input, shape index: {}]   ;;  %s5605_s3 = inlined_call_operand.hbm [shape: bf16[512,512], index: 3, kind: input, shape index: {}]   ;;  %s5606_s4 = inlined_call_operand.vmem [shape: f32[1,512], index: 4, kind: input, shape index: {}]   ;;  %s5607_s5 = inlined_call_operand.hbm [shape: bf16[512,512], index: 5, kind: input, shape index: {}]   ;;  %s5608_s6 = inlined_call_operand.vmem [shape: f32[1,512], index: 6, kind: input, shape index: {}]   ;;  %s5609_s7 = inlined_call_operand.vmem [shape: f32[1,512], index: 7, kind: input, shape index: {}]   ;;  %s5610_s8 = inlined_call_operand.<no memory space> [shape: f32[1,1], index: 8, kind: input, shape index: {}]   ;;  %s5611_s9 = inlined_call_operand.vmem [shape: f32[256,1], index: 9, kind: output, shape index: {}]  }
   0x1   :  { %v14_v0 = vstv %s5610_s8 }
   0x2   :  { %15 = vst [vmem:[#allocation2] sm:$0x1] %v14_v0 }
   0x3   :  { %16 = vsyncpa [#allocation4], 0 }
   0x4   :  { %17 = vsyncpa [#allocation6], 0  ;;  %s4937_s11 = smov 0  }
   0x5 LB: > { %s3755_s12 = sadd.s32 4294967295, %s4877_s11   ;;  %p3757_p0 = scmp.ge.s32.totalorder %s4877_s11, 1  ;;  %s4877_s11 = sphi %s4937_s11, %s23_s11  }
   0x6   : > { %p248_p1 = scmp.lt.s32.totalorder %s4877_s11, 3  ;;  %s4879_s13 = smov [#allocation3]  }
   0x7   : > { %s266_s14 = sshll.u32 %s4879_s13, 4  ;;  %p4951_p3 = scmp.eq.s32.totalorder %s3755_s12, 0  ;;  %s267_s14 = int_to_ptr.vmem [resolvable:$true] %s266_s14 }
   0x8   : > { %p4945_p2 = pnand %p3757_p0, %p248_p1  ;;  %s4880_s16 = smov [#allocation5]  }
   0x9   : > { %s5616_s15 = scalar_select %p4951_p3, 1, 0 }
   0xa   : > { %s5615_s8 = scalar_select %p4945_p2, 1, 0 }
   0xb   : > { %p4329_p4 = pneg %p4945_p2  ;;  %s282_s17 = sshll.u32 %s4880_s16, 4  ;;  %s4963_s17 = int_to_ptr.vmem [resolvable:$true] %s282_s17 }
   0xc   : > { %s4807_s21 = scalar_lea.hbm %s5605_s3, 16384 }
   0xd   : > { %p4959_p5 = pnand %p4951_p3, %p4329_p4  ;;  %p4808_p6 = scmp.ne.s32.totalorder %s5605_s3, %s4807_s21 }
   0xe   : > { %p4814_p10 = scmp.lt.u32.totalorder %s4807_s21, %s5605_s3 }
   0xf   : > { %p4809_p7 = pneg %p4959_p5 }
  0x11   : > { %p4810_p8 = pnand %p4809_p7, %p4808_p6 }
  0x13   : > { %p4811_p9 = pneg %p4810_p8 }
  0x15   : > { %p4816_p11 = pnand %p4814_p10, %p4811_p9 }
  0x17   : > { %4819 = shalt.err (!%p4816_p11)
}
  0x18   : > { %s4820_s26 = scalar_lea.vmem %s267_s14, 16384  ;;  %p4828_p1 = scmp.lt.s32.totalorder %s267_s14, %s267_s14 }
  0x19   : > { %p4821_p12 = scmp.ne.s32.totalorder %s267_s14, %s4820_s26  ;;  %p4829_p4 = scmp.lt.s32.totalorder %s4820_s26, %s4820_s26 }
  0x1b   : > { %p4823_p13 = pnand %p4821_p12, %p4809_p7  ;;  %p4830_p3 = por %p4829_p4, %p4828_p1 }
  0x1d   : > { %p4824_p0 = pneg %p4823_p13 }
  0x1f   : > { %p4831_p2 = pnand %p4830_p3, %p4824_p0 }
  0x21   : > { %4834 = shalt.err (!%p4831_p2)
}
  0x22   : > { %s4881_s27 = smov 256   ;;  %s4882_s28 = smov 16  }
  0x23   : > { %4332 = dma.hbm_to_vmem [thread:$0]  (!%p4959_p5), %s5605_s3, 16384, %s267_s14, [#allocation4], %s4881_s27, %s4881_s27, %s4882_s28  }
  0x24   : > { %s4835_s16 = scalar_lea.hbm %s5607_s5, 16384 }
  0x25   : > { %p4836_p6 = scmp.ne.s32.totalorder %s5607_s5, %s4835_s16  ;;  %p4842_p8 = scmp.lt.u32.totalorder %s4835_s16, %s5607_s5 }
  0x27   : > { %p4838_p2 = pnand %p4836_p6, %p4809_p7 }
  0x29   : > { %p4839_p3 = pneg %p4838_p2 }
  0x2b   : > { %p4844_p9 = pnand %p4842_p8, %p4839_p3 }
  0x2d   : > { %4847 = shalt.err (!%p4844_p9)
}
  0x2e   : > { %s4848_s14 = scalar_lea.vmem %s4963_s17, 16384  ;;  %p4856_p13 = scmp.lt.s32.totalorder %s4963_s17, %s4963_s17 }
  0x2f   : > { %p4849_p10 = scmp.ne.s32.totalorder %s4963_s17, %s4848_s14  ;;  %p4857_p0 = scmp.lt.s32.totalorder %s4848_s14, %s4848_s14 }
  0x31   : > { %p4851_p11 = pnand %p4849_p10, %p4809_p7  ;;  %p4858_p1 = por %p4857_p0, %p4856_p13 }
  0x33   : > { %p4852_p12 = pneg %p4851_p11 }
  0x35   : > { %p4859_p4 = pnand %p4858_p1, %p4852_p12 }
  0x37   : > { %4862 = shalt.err (!%p4859_p4)
}
  0x38   : > { %4335 = dma.hbm_to_vmem [thread:$0]  (!%p4959_p5), %s5607_s5, 16384, %s4963_s17, [#allocation6], %s4881_s27, %s4881_s27, %s4882_s28  }
  0x39   : > { %p5618_p6 = scmp.ne.s32.totalorder %s5615_s8, 0 }
  0x3a   : > { %p5619_p2 = scmp.ne.s32.totalorder (!%p5618_p6), %s5616_s15, 0 }
  0x3b   : > { %316 = sbr.rel (%p5618_p6) target bundleno = 1102 (0x44e), region = 56 }
  0x42   : > { %4868 = dma.done.wait (%p5619_p2), [#allocation4], 16384  }
  0x43   : > { %4870 = vsyncadd (%p5619_p2), [#allocation4], 4294950912 }
  0x44   : > { %4872 = dma.done.wait (%p5619_p2), [#allocation6], 16384  }
  0x45   : > { %4874 = vsyncadd (%p5619_p2), [#allocation6], 4294950912  ;;  %s3764_s18 = sshll.u32 %s3755_s12, 4  ;;  %v4883_v1 = vmov 0   ;;  %vm460_vm0 = vcmask 1044480   ;;  %vm435_vm1 = vcmask 80896  }
  0x46   : > { %505 = vmatprep.mubr.bf16.mxu0 %v4883_v1  ;;  %p357_p5 = scmp.lt.s32.totalorder %s3764_s18, 31  ;;  %618 = vmatprep.mubr.bf16.mxu1 %v4883_v1  ;;  %v4353_v2 = vld [vmem:[%s5603_s1 + $0x4] ss:$16 sps:$4 sm:$0x1f]   ;;  %v4364_v15 = vld [vmem:[#allocation3 + $0xc] ss:$16 sps:$4 sm:$0xff]  }
  0x47   : > { %v4355_v3 = vld [vmem:[%s5603_s1] ss:$16 sps:$4 sm:$0x1f]   ;;  %3772 = vmatprep.subr.msk.bf16.mxu0 %vm460_vm0, %v4353_v2  ;;  %v4356_v10 = vld [vmem:[%s5603_s1 + $0xc] ss:$16 sps:$4 sm:$0x1f]  }
  0x48   : > { %s5621_s18 = smov (!%p357_p5, %s3764_s18), 31  ;;  %v462_v6 = vsel %vm460_vm0, %v4355_v3, 0  ;;  %v4358_v11 = vld [vmem:[%s5603_s1 + $0x8] ss:$16 sps:$4 sm:$0x1f]   ;;  %3781 = vmatprep.subr.msk.bf16.mxu1 %vm460_vm0, %v4356_v10  ;;  %vm3660_vm2 = vcmask 7168  }
  0x49   : > { %s3765_s8 = sshll.u32 %s5621_s18, 3  ;;  %474 = vmatpush1.bf16.msra.mxu0 %v462_v6  ;;  %v4359_v12 = vld [vmem:[#allocation3] ss:$16 sps:$4 sm:$0xff]   ;;  %v4361_v13 = vld [vmem:[#allocation3 + $0x4] ss:$16 sps:$4 sm:$0xff]   ;;  %v468_v14 = vsel %vm460_vm0, %v4358_v11, 0 }
  0x4a   : > { %s5034_s15 = scalar_lea.vmem %s5602_s0, %s3765_s8  ;;  %587 = vmatpush1.bf16.msra.mxu1 %v468_v14  ;;  %1521 = vmatprep.subr.bf16.mxu0 %v4361_v13  ;;  %v4362_v17 = vld [vmem:[#allocation3 + $0x8] ss:$16 sps:$4 sm:$0xff]   ;;  %v4367_v18 = vld [vmem:[#allocation3 + $0x24] ss:$16 sps:$4 sm:$0xff]   ;;  %v4365_v19 = vld [vmem:[#allocation3 + $0x20] ss:$16 sps:$4 sm:$0xff]  }
  0x4b   : > { %v369_v4 = vld [vmem:[%s5034_s15] sm:$0xff]  ;;  %v370_v5 = vld [vmem:[%s5034_s15 + $0x8] sm:$0xff]  ;;  %v371_v8 = vld [vmem:[%s5034_s15 + $0x10] sm:$0xff]  ;;  %1747 = vmatprep.subr.bf16.mxu1 %v4364_v15 }
  0x4c   : > { %v385_v7 = vpack.c.bf16 %v370_v5, %v369_v4  ;;  %v372_v9 = vld [vmem:[%s5034_s15 + $0x18] sm:$0xff]  ;;  %v373_v21 = vld [vmem:[%s5034_s15 + $0x20] sm:$0xff]  ;;  %v374_v23 = vld [vmem:[%s5034_s15 + $0x28] sm:$0xff] }
  0x4d   : > { %v386_v16 = vpack.c.bf16 %v372_v9, %v371_v8  ;;  %v4370_v20 = vld [vmem:[#allocation3 + $0x2c] ss:$16 sps:$4 sm:$0xff]   ;;  %v4373_v22 = vld [vmem:[#allocation3 + $0x44] ss:$16 sps:$4 sm:$0xff]   ;;  %v4368_v24 = vld [vmem:[#allocation3 + $0x28] ss:$16 sps:$4 sm:$0xff]   ;;  %v387_v28 = vpack.c.bf16 %v374_v23, %v373_v21 }
  0x4e   : > { %3773 = vmatmul.mubr.msk.bf16.vlgmr.msra.gmra.mrb[0].mxu0 %vm435_vm1, %v385_v7  ;;  %3782 = vmatmul.mubr.msk.bf16.vlgmr.msra.gmra.mrb[0].mxu1 %vm435_vm1, %v385_v7  ;;  %v4371_v25 = vld [vmem:[#allocation3 + $0x40] ss:$16 sps:$4 sm:$0xff]   ;;  %v4376_v26 = vld [vmem:[#allocation3 + $0x4c] ss:$16 sps:$4 sm:$0xff]   ;;  %v4379_v27 = vld [vmem:[#allocation3 + $0x64] ss:$16 sps:$4 sm:$0xff]  }
  0x4f   : > { %515 = vmatprep.mubr.bf16.mxu0 %v4883_v1  ;;  %1522 = vmatpush1.bf16.msra.mxu0 %v4359_v12  ;;  %v4374_v29 = vld [vmem:[#allocation3 + $0x48] ss:$16 sps:$4 sm:$0xff]   ;;  %v4377_v30 = vld [vmem:[#allocation3 + $0x60] ss:$16 sps:$4 sm:$0xff]   ;;  %v4382_v31 = vld [vmem:[#allocation3 + $0x6c] ss:$16 sps:$4 sm:$0xff]  }
  0x50   : > { %1523 = vmatprep.subr.bf16.mxu0 %v4367_v18  ;;  %628 = vmatprep.mubr.bf16.mxu1 %v4883_v1  ;;  %v375_v32 = vld [vmem:[%s5034_s15 + $0x30] sm:$0xff]  ;;  %v376_v34 = vld [vmem:[%s5034_s15 + $0x38] sm:$0xff]  ;;  %v377_v43 = vld [vmem:[%s5034_s15 + $0x40] sm:$0xff] }
  0x51   : > { %1748 = vmatpush1.bf16.msra.mxu1 %v4362_v17  ;;  %v4385_v33 = vld [vmem:[#allocation3 + $0x84] ss:$16 sps:$4 sm:$0xff]   ;;  %v4380_v35 = vld [vmem:[#allocation3 + $0x68] ss:$16 sps:$4 sm:$0xff]   ;;  %v4383_v36 = vld [vmem:[#allocation3 + $0x80] ss:$16 sps:$4 sm:$0xff]   ;;  %v388_v39 = vpack.c.bf16 %v376_v34, %v375_v32  ;;  %v399_v34 = vlaneseq }
  0x52   : > { %1749 = vmatprep.subr.bf16.mxu1 %v4370_v20  ;;  %v4388_v37 = vld [vmem:[#allocation3 + $0x8c] ss:$16 sps:$4 sm:$0xff]   ;;  %v4391_v38 = vld [vmem:[#allocation3 + $0xa4] ss:$16 sps:$4 sm:$0xff]   ;;  %v4386_v40 = vld [vmem:[#allocation3 + $0x88] ss:$16 sps:$4 sm:$0xff]  }
  0x53   : > { %1524 = vmatpush1.bf16.msra.mxu0 %v4365_v19  ;;  %v4389_v41 = vld [vmem:[#allocation3 + $0xa0] ss:$16 sps:$4 sm:$0xff]   ;;  %v4394_v42 = vld [vmem:[#allocation3 + $0xac] ss:$16 sps:$4 sm:$0xff]   ;;  %v4397_v44 = vld [vmem:[#allocation3 + $0xc4] ss:$16 sps:$4 sm:$0xff]  }
  0x54   : > { %1525 = vmatprep.subr.bf16.mxu0 %v4373_v22  ;;  %v378_v45 = vld [vmem:[%s5034_s15 + $0x48] sm:$0xff]  ;;  %v4395_v47 = vld [vmem:[#allocation3 + $0xc0] ss:$16 sps:$4 sm:$0xff]   ;;  %v380_v56 = vld [vmem:[%s5034_s15 + $0x58] sm:$0xff] }
  0x55   : > { %1750 = vmatpush1.bf16.msra.mxu1 %v4368_v24  ;;  %v4392_v46 = vld [vmem:[#allocation3 + $0xa8] ss:$16 sps:$4 sm:$0xff]   ;;  %v4400_v48 = vld [vmem:[#allocation3 + $0xcc] ss:$16 sps:$4 sm:$0xff]   ;;  %v4403_v49 = vld [vmem:[#allocation3 + $0xe4] ss:$16 sps:$4 sm:$0xff]   ;;  %v389_v50 = vpack.c.bf16 %v378_v45, %v377_v43 }
  0x56   : > { %3774 = vmatmul.mubr.msk.bf16.gmra.mrb[4].mxu0 %vm435_vm1, %v386_v16  ;;  %1751 = vmatprep.subr.bf16.mxu1 %v4376_v26  ;;  %v4398_v51 = vld [vmem:[#allocation3 + $0xc8] ss:$16 sps:$4 sm:$0xff]   ;;  %v4401_v52 = vld [vmem:[#allocation3 + $0xe0] ss:$16 sps:$4 sm:$0xff]   ;;  %v4406_v53 = vld [vmem:[#allocation3 + $0xec] ss:$16 sps:$4 sm:$0xff]  }
  0x57   : > { %525 = vmatprep.mubr.bf16.mxu0 %v4883_v1  ;;  %1526 = vmatpush1.bf16.msra.mxu0 %v4371_v25  ;;  %v379_v54 = vld [vmem:[%s5034_s15 + $0x50] sm:$0xff]  ;;  %v4404_v57 = vld [vmem:[#allocation3 + $0xe8] ss:$16 sps:$4 sm:$0xff]   ;;  %v381_v3 = vld [vmem:[%s5034_s15 + $0x60] sm:$0xff] }
  0x58   : > { %3783 = vmatmul.mubr.msk.bf16.gmra.mrb[4].mxu1 %vm435_vm1, %v386_v16  ;;  %1527 = vmatprep.subr.bf16.mxu0 %v4379_v27  ;;  %v4409_v55 = vld [vmem:[#allocation3 + $0x104] ss:$16 sps:$4 sm:$0xff]   ;;  %v4407_v58 = vld [vmem:[#allocation3 + $0x100] ss:$16 sps:$4 sm:$0xff]   ;;  %v4412_v59 = vld [vmem:[#allocation3 + $0x10c] ss:$16 sps:$4 sm:$0xff]   ;;  %v390_v61 = vpack.c.bf16 %v380_v56, %v379_v54 }
  0x59   : > { %638 = vmatprep.mubr.bf16.mxu1 %v4883_v1  ;;  %1752 = vmatpush1.bf16.msra.mxu1 %v4374_v29  ;;  %v4415_v60 = vld [vmem:[#allocation3 + $0x124] ss:$16 sps:$4 sm:$0xff]   ;;  %v4410_v62 = vld [vmem:[#allocation3 + $0x108] ss:$16 sps:$4 sm:$0xff]   ;;  %v4413_v63 = vld [vmem:[#allocation3 + $0x120] ss:$16 sps:$4 sm:$0xff]  }
  0x5a   : > { %1753 = vmatprep.subr.bf16.mxu1 %v4382_v31  ;;  %v4418_v0 = vld [vmem:[#allocation3 + $0x12c] ss:$16 sps:$4 sm:$0xff]   ;;  %v4421_v2 = vld [vmem:[#allocation3 + $0x144] ss:$16 sps:$4 sm:$0xff]   ;;  %v4416_v5 = vld [vmem:[#allocation3 + $0x128] ss:$16 sps:$4 sm:$0xff]  }
  0x5b   : > { %1528 = vmatpush1.bf16.msra.mxu0 %v4377_v30  ;;  %v382_v4 = vld [vmem:[%s5034_s15 + $0x68] sm:$0xff]  ;;  %v4419_v6 = vld [vmem:[#allocation3 + $0x140] ss:$16 sps:$4 sm:$0xff]   ;;  %v384_v15 = vld [vmem:[%s5034_s15 + $0x78] sm:$0xff] }
  0x5c   : > { %1529 = vmatprep.subr.bf16.mxu0 %v4385_v33  ;;  %v4424_v7 = vld [vmem:[#allocation3 + $0x14c] ss:$16 sps:$4 sm:$0xff]   ;;  %v4427_v8 = vld [vmem:[#allocation3 + $0x164] ss:$16 sps:$4 sm:$0xff]   ;;  %v4422_v9 = vld [vmem:[#allocation3 + $0x148] ss:$16 sps:$4 sm:$0xff]   ;;  %v391_v10 = vpack.c.bf16 %v382_v4, %v381_v3 }
  0x5d   : > { %1754 = vmatpush1.bf16.msra.mxu1 %v4380_v35  ;;  %v4425_v11 = vld [vmem:[#allocation3 + $0x160] ss:$16 sps:$4 sm:$0xff]   ;;  %v4430_v12 = vld [vmem:[#allocation3 + $0x16c] ss:$16 sps:$4 sm:$0xff]   ;;  %v4433_v13 = vld [vmem:[#allocation3 + $0x184] ss:$16 sps:$4 sm:$0xff]  }
  0x5e   : > { %3775 = vmatmul.mubr.msk.bf16.gmra.mrb[8].mxu0 %vm435_vm1, %v387_v28  ;;  %1755 = vmatprep.subr.bf16.mxu1 %v4388_v37  ;;  %v383_v14 = vld [vmem:[%s5034_s15 + $0x70] sm:$0xff]  ;;  %v4428_v16 = vld [vmem:[#allocation3 + $0x168] ss:$16 sps:$4 sm:$0xff]   ;;  %v400_v35 = vshrl.u32 %v399_v34, 7  ;;  %v397_v37 = vld [vmem:[%s5604_s2] sm:$0xf]  ;;  %s5556_s15 = scalar_lea.vmem %s5611_s9, %s3765_s8 }
  0x5f   : > { %535 = vmatprep.mubr.bf16.mxu0 %v4883_v1  ;;  %1530 = vmatpush1.bf16.msra.mxu0 %v4383_v36  ;;  %v4431_v17 = vld [vmem:[#allocation3 + $0x180] ss:$16 sps:$4 sm:$0xff]   ;;  %v4436_v18 = vld [vmem:[#allocation3 + $0x18c] ss:$16 sps:$4 sm:$0xff]   ;;  %v4439_v19 = vld [vmem:[#allocation3 + $0x1a4] ss:$16 sps:$4 sm:$0xff]   ;;  %v392_v21 = vpack.c.bf16 %v384_v15, %v383_v14 }
  0x60   : > { %3784 = vmatmul.mubr.msk.bf16.gmra.mrb[8].mxu1 %vm435_vm1, %v387_v28  ;;  %1531 = vmatprep.subr.bf16.mxu0 %v4391_v38  ;;  %v4434_v20 = vld [vmem:[#allocation3 + $0x188] ss:$16 sps:$4 sm:$0xff]   ;;  %v4437_v22 = vld [vmem:[#allocation3 + $0x1a0] ss:$16 sps:$4 sm:$0xff]   ;;  %v4442_v23 = vld [vmem:[#allocation3 + $0x1ac] ss:$16 sps:$4 sm:$0xff]  }
  0x61   : > { %648 = vmatprep.mubr.bf16.mxu1 %v4883_v1  ;;  %1756 = vmatpush1.bf16.msra.mxu1 %v4386_v40  ;;  %v4440_v24 = vld [vmem:[#allocation3 + $0x1a8] ss:$16 sps:$4 sm:$0xff]   ;;  %v4445_v25 = vld [vmem:[#allocation3 + $0x1c4] ss:$16 sps:$4 sm:$0xff]   ;;  %v4448_v26 = vld [vmem:[#allocation3 + $0x1cc] ss:$16 sps:$4 sm:$0xff]  }
  0x62   : > { %1757 = vmatprep.subr.bf16.mxu1 %v4394_v42  ;;  %v4443_v27 = vld [vmem:[#allocation3 + $0x1c0] ss:$16 sps:$4 sm:$0xff]   ;;  %v4446_v28 = vld [vmem:[#allocation3 + $0x1c8] ss:$16 sps:$4 sm:$0xff]   ;;  %v4451_v29 = vld [vmem:[#allocation3 + $0x1e4] ss:$16 sps:$4 sm:$0xff]  }
  0x63   : > { %1532 = vmatpush1.bf16.msra.mxu0 %v4389_v41  ;;  %v4454_v30 = vld [vmem:[#allocation3 + $0x1ec] ss:$16 sps:$4 sm:$0xff]   ;;  %v4449_v31 = vld [vmem:[#allocation3 + $0x1e0] ss:$16 sps:$4 sm:$0xff]   ;;  %v4452_v32 = vld [vmem:[#allocation3 + $0x1e8] ss:$16 sps:$4 sm:$0xff]  }
  0x64   : > { %1533 = vmatprep.subr.bf16.mxu0 %v4397_v44  ;;  %v4460_v33 = vld [vmem:[#allocation3 + $0x20c] ss:$16 sps:$4 sm:$0xff]   ;;  %v5098_v36 = vsub.s32 0, %v400_v35  ;;  %v5103_v38 = vsub.s32 1, %v400_v35  ;;  %v5111_v42 = vsub.s32 2, %v400_v35  ;;  %v5113_v44 = vsub.s32 3, %v400_v35 }
  0x65   : > { %1758 = vmatpush1.bf16.msra.mxu1 %v4392_v46  ;;  %v4458_v56 = vld [vmem:[#allocation3 + $0x208] ss:$16 sps:$4 sm:$0xff]   ;;  %v4461_v4 = vld [vmem:[#allocation3 + $0x220] ss:$16 sps:$4 sm:$0xff]  }
  0x66   : > { %3776 = vmatmul.mubr.msk.bf16.gmra.mrb[12].mxu0 %vm435_vm1, %v388_v39  ;;  %1759 = vmatprep.subr.bf16.mxu1 %v4400_v48  ;;  %v5109_v41 = vrot.slane %v397_v37, %v5103_v38 }
  0x67   : > { %545 = vmatprep.mubr.bf16.mxu0 %v4883_v1  ;;  %1534 = vmatpush1.bf16.msra.mxu0 %v4395_v47 }
  0x68   : > { %3785 = vmatmul.mubr.msk.bf16.gmra.mrb[12].mxu1 %vm435_vm1, %v388_v39  ;;  %1535 = vmatprep.subr.bf16.mxu0 %v4403_v49  ;;  %v5106_v39 = vrot.slane %v397_v37, %v5098_v36 }
  0x69   : > { %658 = vmatprep.mubr.bf16.mxu1 %v4883_v1  ;;  %1760 = vmatpush1.bf16.msra.mxu1 %v4398_v51  ;;  %v5120_v51 = vrot.slane %v397_v37, %v5111_v42 }
  0x6a   : > { %1761 = vmatprep.subr.bf16.mxu1 %v4406_v53  ;;  %v5123_v53 = vrot.slane %v397_v37, %v5113_v44 }
  0x6b   : > { %1536 = vmatpush1.bf16.msra.mxu0 %v4401_v52 }
  0x6c   : > { %1537 = vmatprep.subr.bf16.mxu0 %v4409_v55  ;;  %v4455_v55 = vld [vmem:[#allocation3 + $0x200] ss:$16 sps:$4 sm:$0xff]  }
  0x6d   : > { %1762 = vmatpush1.bf16.msra.mxu1 %v4404_v57  ;;  %v4463_v57 = vld [vmem:[#allocation3 + $0x224] ss:$16 sps:$4 sm:$0xff]  }
  0x6e   : > { %3777 = vmatmul.mubr.msk.bf16.gmra.mrb[16].mxu0 %vm435_vm1, %v389_v50  ;;  %1763 = vmatprep.subr.bf16.mxu1 %v4412_v59 }
  0x6f   : > { %555 = vmatprep.mubr.bf16.mxu0 %v4883_v1  ;;  %1538 = vmatpush1.bf16.msra.mxu0 %v4407_v58  ;;  %v4466_v58 = vld [vmem:[#allocation3 + $0x22c] ss:$16 sps:$4 sm:$0xff]  }
  0x70   : > { %3786 = vmatmul.mubr.msk.bf16.gmra.mrb[16].mxu1 %vm435_vm1, %v389_v50  ;;  %1539 = vmatprep.subr.bf16.mxu0 %v4415_v60 }
  0x71   : > { %668 = vmatprep.mubr.bf16.mxu1 %v4883_v1  ;;  %1764 = vmatpush1.bf16.msra.mxu1 %v4410_v62 }
  0x72   : > { %1765 = vmatprep.subr.bf16.mxu1 %v4418_v0 }
  0x73   : > { %1540 = vmatpush1.bf16.msra.mxu0 %v4413_v63 }
  0x74   : > { %1541 = vmatprep.subr.bf16.mxu0 %v4421_v2 }
  0x75   : > { %1766 = vmatpush1.bf16.msra.mxu1 %v4416_v5  ;;  %v4464_v5 = vld [vmem:[#allocation3 + $0x228] ss:$16 sps:$4 sm:$0xff]  }
  0x76   : > { %3778 = vmatmul.mubr.msk.bf16.gmra.mrb[20].mxu0 %vm435_vm1, %v390_v61  ;;  %1767 = vmatprep.subr.bf16.mxu1 %v4424_v7 }
  0x77   : > { %565 = vmatprep.mubr.bf16.mxu0 %v4883_v1  ;;  %1542 = vmatpush1.bf16.msra.mxu0 %v4419_v6 }
  0x78   : > { %3787 = vmatmul.mubr.msk.bf16.gmra.mrb[20].mxu1 %vm435_vm1, %v390_v61  ;;  %1543 = vmatprep.subr.bf16.mxu0 %v4427_v8 }
  0x79   : > { %678 = vmatprep.mubr.bf16.mxu1 %v4883_v1  ;;  %1768 = vmatpush1.bf16.msra.mxu1 %v4422_v9 }
  0x7a   : > { %1769 = vmatprep.subr.bf16.mxu1 %v4430_v12  ;;  %v4472_v12 = vld [vmem:[#allocation3 + $0x24c] ss:$16 sps:$4 sm:$0xff]  }
  0x7b   : > { %1544 = vmatpush1.bf16.msra.mxu0 %v4425_v11  ;;  %v4469_v11 = vld [vmem:[#allocation3 + $0x244] ss:$16 sps:$4 sm:$0xff]  }
  0x7c   : > { %1545 = vmatprep.subr.bf16.mxu0 %v4433_v13 }
  0x7d   : > { %1770 = vmatpush1.bf16.msra.mxu1 %v4428_v16 }
  0x7e   : > { %3779 = vmatmul.mubr.msk.bf16.gmra.mrb[24].mxu0 %vm435_vm1, %v391_v10  ;;  %1771 = vmatprep.subr.bf16.mxu1 %v4436_v18 }
  0x7f   : > { %575 = vmatprep.mubr.bf16.mxu0 %v4883_v1  ;;  %1546 = vmatpush1.bf16.msra.mxu0 %v4431_v17 }
  0x80   : > { %3788 = vmatmul.mubr.msk.bf16.gmra.mrb[24].mxu1 %vm435_vm1, %v391_v10  ;;  %1547 = vmatprep.subr.bf16.mxu0 %v4439_v19 }
  0x81   : > { %688 = vmatprep.mubr.bf16.mxu1 %v4883_v1  ;;  %1772 = vmatpush1.bf16.msra.mxu1 %v4434_v20  ;;  %v4457_v1 = vld [vmem:[#allocation3 + $0x204] ss:$16 sps:$4 sm:$0xff]   ;;  %v4467_v20 = vld [vmem:[#allocation3 + $0x240] ss:$16 sps:$4 sm:$0xff]  }
  0x82   : > { %1773 = vmatprep.subr.bf16.mxu1 %v4442_v23  ;;  %v4478_v23 = vld [vmem:[#allocation3 + $0x26c] ss:$16 sps:$4 sm:$0xff]  }
  0x83   : > { %1548 = vmatpush1.bf16.msra.mxu0 %v4437_v22  ;;  %v4475_v22 = vld [vmem:[#allocation3 + $0x264] ss:$16 sps:$4 sm:$0xff]  }
  0x84   : > { %1549 = vmatprep.subr.bf16.mxu0 %v4445_v25 }
  0x85   : > { %1774 = vmatpush1.bf16.msra.mxu1 %v4440_v24 }
  0x86   : > { %3780 = vmatmul.mubr.msk.bf16.gmra.mrb[28].mxu0 %vm435_vm1, %v392_v21  ;;  %1775 = vmatprep.subr.bf16.mxu1 %v4448_v26 }
  0x87   : > { %1550 = vmatpush1.bf16.msra.mxu0 %v4443_v27 }
  0x88   : > { %3789 = vmatmul.mubr.msk.bf16.gmra.mrb[28].mxu1 %vm435_vm1, %v392_v21  ;;  %1551 = vmatprep.subr.bf16.mxu0 %v4451_v29  ;;  %v4470_v21 = vld [vmem:[#allocation3 + $0x248] ss:$16 sps:$4 sm:$0xff]  }
  0x89   : > { %1776 = vmatpush1.bf16.msra.mxu1 %v4446_v28 }
  0x8a   : > { %1777 = vmatprep.subr.bf16.mxu1 %v4454_v30 }
  0x8b   : > { %1552 = vmatpush1.bf16.msra.mxu0 %v4449_v31 }
  0x8c   : > { %1634 = vmatprep.subr.bf16.mxu0 %v4457_v1  ;;  %v4476_v1 = vld [vmem:[#allocation3 + $0x268] ss:$16 sps:$4 sm:$0xff]  }
  0x8d   : > { %1778 = vmatpush1.bf16.msra.mxu1 %v4452_v32  ;;  %v4473_v32 = vld [vmem:[#allocation3 + $0x260] ss:$16 sps:$4 sm:$0xff]  }
  0x8e   : > { %1860 = vmatprep.subr.bf16.mxu1 %v4460_v33 }
 0x121   : > { %v507_v40 = vpop.f32.mrb[0].mxu0  ;;  %v620_v59 = vpop.f32.mrb[0].mxu1 }
 0x122   : > { %v509_v43 = vpop.f32.mrb[1].mxu0  ;;  %v508_v46 = vadd.f32 %v507_v40, %v5106_v39  ;;  %v621_v61 = vadd.f32 %v620_v59, %v5120_v51  ;;  %v622_v62 = vpop.f32.mrb[1].mxu1 }
 0x123   : > { %v511_v45 = vpop.f32.mrb[2].mxu0  ;;  %v510_v49 = vadd.f32 %v509_v43, %v5109_v41  ;;  %v623_v0 = vadd.f32 %v622_v62, %v5123_v53  ;;  %v624_v2 = vpop.f32.mrb[2].mxu1  ;;  %v4481_v43 = vld [vmem:[#allocation3 + $0x284] ss:$16 sps:$4 sm:$0xff]  }
 0x124   : > { %v512_v47 = vadd.f32 %v511_v45, %v5106_v39  ;;  %v513_v48 = vpop.f32.mrb[3].mxu0  ;;  %v625_v6 = vadd.f32 %v624_v2, %v5120_v51  ;;  %v626_v7 = vpop.f32.mrb[3].mxu1  ;;  %v4484_v45 = vld [vmem:[#allocation3 + $0x28c] ss:$16 sps:$4 sm:$0xff]  }
 0x125   : > { %v514_v50 = vadd.f32 %v513_v48, %v5109_v41  ;;  %v627_v13 = vadd.f32 %v626_v7, %v5123_v53 }
 0x126   : > { %v699_v52 = vpack.c.bf16 %v512_v47, %v508_v46  ;;  %v5133_v16 = vpack.c.bf16 %v625_v6, %v621_v61 }
 0x127   : > { %v700_v54 = vpack.c.bf16 %v514_v50, %v510_v49  ;;  %v5135_v18 = vpack.c.bf16 %v627_v13, %v623_v0 }
 0x129   : > { %v517_v60 = vpop.f32.mrb[4].mxu0  ;;  %1553 = vmatprep.mubr.bf16.mxu0 %v700_v54  ;;  %1779 = vmatprep.mubr.bf16.mxu1 %v700_v54 }
 0x12a   : > { %v519_v63 = vpop.f32.mrb[5].mxu0  ;;  %1554 = vmatmul.mubr.bf16.vlgmr.msra.gmra.mrb[32].mxu0 %v699_v52  ;;  %1780 = vmatmul.mubr.bf16.vlgmr.msra.gmra.mrb[32].mxu1 %v699_v52  ;;  %v518_v8 = vadd.f32 %v517_v60, %v5106_v39 }
 0x12b   : > { %1635 = vmatpush1.bf16.msra.mxu0 %v4455_v55  ;;  %v521_v3 = vpop.f32.mrb[6].mxu0  ;;  %1861 = vmatpush1.bf16.msra.mxu1 %v4458_v56  ;;  %v520_v14 = vadd.f32 %v519_v63, %v5109_v41  ;;  %v630_v24 = vpop.f32.mrb[4].mxu1  ;;  %v4479_v55 = vld [vmem:[#allocation3 + $0x280] ss:$16 sps:$4 sm:$0xff]   ;;  %v4482_v56 = vld [vmem:[#allocation3 + $0x288] ss:$16 sps:$4 sm:$0xff]  }
 0x12c   : > { %v522_v9 = vadd.f32 %v521_v3, %v5106_v39  ;;  %v523_v10 = vpop.f32.mrb[7].mxu0  ;;  %1636 = vmatprep.subr.bf16.mxu0 %v4463_v57  ;;  %1862 = vmatprep.subr.bf16.mxu1 %v4466_v58  ;;  %v631_v26 = vadd.f32 %v630_v24, %v5120_v51  ;;  %v632_v27 = vpop.f32.mrb[5].mxu1  ;;  %v4487_v57 = vld [vmem:[#allocation3 + $0x2a4] ss:$16 sps:$4 sm:$0xff]   ;;  %v4490_v58 = vld [vmem:[#allocation3 + $0x2ac] ss:$16 sps:$4 sm:$0xff]  }
 0x12d   : > { %v524_v15 = vadd.f32 %v523_v10, %v5109_v41  ;;  %v633_v29 = vadd.f32 %v632_v27, %v5123_v53  ;;  %v634_v30 = vpop.f32.mrb[6].mxu1  ;;  %v4499_v24 = vld [vmem:[#allocation3 + $0x2e4] ss:$16 sps:$4 sm:$0xff]  }
 0x12e   : > { %v703_v17 = vpack.c.bf16 %v522_v9, %v518_v8  ;;  %v635_v33 = vadd.f32 %v634_v30, %v5120_v51  ;;  %v636_v34 = vpop.f32.mrb[7].mxu1 }
 0x12f   : > { %v704_v19 = vpack.c.bf16 %v524_v15, %v520_v14  ;;  %1637 = vmatpush1.bf16.msra.mxu0 %v4461_v4  ;;  %1863 = vmatpush1.bf16.msra.mxu1 %v4464_v5  ;;  %v637_v46 = vadd.f32 %v636_v34, %v5123_v53  ;;  %v4485_v4 = vld [vmem:[#allocation3 + $0x2a0] ss:$16 sps:$4 sm:$0xff]   ;;  %v4488_v5 = vld [vmem:[#allocation3 + $0x2a8] ss:$16 sps:$4 sm:$0xff]  }
 0x130   : > { %1638 = vmatprep.subr.bf16.mxu0 %v4469_v11  ;;  %1864 = vmatprep.subr.bf16.mxu1 %v4472_v12  ;;  %v5145_v49 = vpack.c.bf16 %v635_v33, %v631_v26  ;;  %v4493_v11 = vld [vmem:[#allocation3 + $0x2c4] ss:$16 sps:$4 sm:$0xff]   ;;  %v4496_v12 = vld [vmem:[#allocation3 + $0x2cc] ss:$16 sps:$4 sm:$0xff]   ;;  %v4497_v33 = vld [vmem:[#allocation3 + $0x2e0] ss:$16 sps:$4 sm:$0xff]  }
 0x131   : > { %v527_v25 = vpop.f32.mrb[8].mxu0  ;;  %1563 = vmatprep.mubr.bf16.mxu0 %v704_v19  ;;  %1789 = vmatprep.mubr.bf16.mxu1 %v704_v19  ;;  %v5147_v52 = vpack.c.bf16 %v637_v46, %v633_v29  ;;  %v4500_v34 = vld [vmem:[#allocation3 + $0x2e8] ss:$16 sps:$4 sm:$0xff]   ;;  %v4505_v46 = vld [vmem:[#allocation3 + $0x304] ss:$16 sps:$4 sm:$0xff]  }
 0x132   : > { %v529_v28 = vpop.f32.mrb[9].mxu0  ;;  %1564 = vmatmul.mubr.bf16.gmra.mrb[36].mxu0 %v703_v17  ;;  %1790 = vmatmul.mubr.bf16.gmra.mrb[36].mxu1 %v703_v17  ;;  %v528_v35 = vadd.f32 %v527_v25, %v5106_v39  ;;  %v4502_v25 = vld [vmem:[#allocation3 + $0x2ec] ss:$16 sps:$4 sm:$0xff]  }
 0x133   : > { %1639 = vmatpush1.bf16.msra.mxu0 %v4467_v20  ;;  %v531_v31 = vpop.f32.mrb[10].mxu0  ;;  %1865 = vmatpush1.bf16.msra.mxu1 %v4470_v21  ;;  %v530_v47 = vadd.f32 %v529_v28, %v5109_v41  ;;  %v640_v59 = vpop.f32.mrb[8].mxu1 }
 0x134   : > { %v532_v37 = vadd.f32 %v531_v31, %v5106_v39  ;;  %v533_v40 = vpop.f32.mrb[11].mxu0  ;;  %1640 = vmatprep.subr.bf16.mxu0 %v4475_v22  ;;  %1866 = vmatprep.subr.bf16.mxu1 %v4478_v23  ;;  %v641_v61 = vadd.f32 %v640_v59, %v5120_v51  ;;  %v642_v62 = vpop.f32.mrb[9].mxu1  ;;  %v4491_v22 = vld [vmem:[#allocation3 + $0x2c0] ss:$16 sps:$4 sm:$0xff]   ;;  %v4494_v23 = vld [vmem:[#allocation3 + $0x2c8] ss:$16 sps:$4 sm:$0xff]  }
 0x135   : > { %v534_v48 = vadd.f32 %v533_v40, %v5109_v41  ;;  %v643_v0 = vadd.f32 %v642_v62, %v5123_v53  ;;  %v644_v2 = vpop.f32.mrb[10].mxu1  ;;  %v4503_v59 = vld [vmem:[#allocation3 + $0x300] ss:$16 sps:$4 sm:$0xff]   ;;  %v4514_v62 = vld [vmem:[#allocation3 + $0x32c] ss:$16 sps:$4 sm:$0xff]  }
 0x136   : > { %v707_v50 = vpack.c.bf16 %v532_v37, %v528_v35  ;;  %v645_v6 = vadd.f32 %v644_v2, %v5120_v51  ;;  %v646_v7 = vpop.f32.mrb[11].mxu1 }
 0x137   : > { %v708_v54 = vpack.c.bf16 %v534_v48, %v530_v47  ;;  %1641 = vmatpush1.bf16.msra.mxu0 %v4473_v32  ;;  %1867 = vmatpush1.bf16.msra.mxu1 %v4476_v1  ;;  %v647_v13 = vadd.f32 %v646_v7, %v5123_v53  ;;  %v4508_v47 = vld [vmem:[#allocation3 + $0x30c] ss:$16 sps:$4 sm:$0xff]  }
 0x138   : > { %1642 = vmatprep.subr.bf16.mxu0 %v4481_v43  ;;  %1868 = vmatprep.subr.bf16.mxu1 %v4484_v45  ;;  %v5157_v17 = vpack.c.bf16 %v645_v6, %v641_v61  ;;  %v4511_v61 = vld [vmem:[#allocation3 + $0x324] ss:$16 sps:$4 sm:$0xff]  }
 0x139   : > { %v537_v60 = vpop.f32.mrb[12].mxu0  ;;  %1573 = vmatprep.mubr.bf16.mxu0 %v708_v54  ;;  %1799 = vmatprep.mubr.bf16.mxu1 %v708_v54  ;;  %v5159_v20 = vpack.c.bf16 %v647_v13, %v643_v0 }
 0x13a   : > { %v539_v63 = vpop.f32.mrb[13].mxu0  ;;  %1574 = vmatmul.mubr.bf16.gmra.mrb[40].mxu0 %v707_v50  ;;  %1800 = vmatmul.mubr.bf16.gmra.mrb[40].mxu1 %v707_v50  ;;  %v538_v8 = vadd.f32 %v537_v60, %v5106_v39  ;;  %v4506_v60 = vld [vmem:[#allocation3 + $0x308] ss:$16 sps:$4 sm:$0xff]  }
 0x13b   : > { %1643 = vmatpush1.bf16.msra.mxu0 %v4479_v55  ;;  %v541_v3 = vpop.f32.mrb[14].mxu0  ;;  %1869 = vmatpush1.bf16.msra.mxu1 %v4482_v56  ;;  %v540_v14 = vadd.f32 %v539_v63, %v5109_v41  ;;  %v650_v26 = vpop.f32.mrb[12].mxu1 }
 0x13c   : > { %v542_v9 = vadd.f32 %v541_v3, %v5106_v39  ;;  %v543_v10 = vpop.f32.mrb[15].mxu0  ;;  %1644 = vmatprep.subr.bf16.mxu0 %v4487_v57  ;;  %1870 = vmatprep.subr.bf16.mxu1 %v4490_v58  ;;  %v651_v28 = vadd.f32 %v650_v26, %v5120_v51  ;;  %v652_v29 = vpop.f32.mrb[13].mxu1 }
 0x13d   : > { %v544_v15 = vadd.f32 %v543_v10, %v5109_v41  ;;  %v653_v31 = vadd.f32 %v652_v29, %v5123_v53  ;;  %v654_v32 = vpop.f32.mrb[14].mxu1  ;;  %v4518_v29 = vld [vmem:[#allocation3 + $0x348] ss:$16 sps:$4 sm:$0xff]  }
 0x13e   : > { %v711_v19 = vpack.c.bf16 %v542_v9, %v538_v8  ;;  %v655_v35 = vadd.f32 %v654_v32, %v5120_v51  ;;  %v656_v37 = vpop.f32.mrb[15].mxu1  ;;  %v4509_v8 = vld [vmem:[#allocation3 + $0x320] ss:$16 sps:$4 sm:$0xff]   ;;  %v4512_v9 = vld [vmem:[#allocation3 + $0x328] ss:$16 sps:$4 sm:$0xff]  }
 0x13f   : > { %v712_v21 = vpack.c.bf16 %v544_v15, %v540_v14  ;;  %1645 = vmatpush1.bf16.msra.mxu0 %v4485_v4  ;;  %1871 = vmatpush1.bf16.msra.mxu1 %v4488_v5  ;;  %v657_v48 = vadd.f32 %v656_v37, %v5123_v53  ;;  %v4517_v15 = vld [vmem:[#allocation3 + $0x344] ss:$16 sps:$4 sm:$0xff]  }
 0x140   : > { %1646 = vmatprep.subr.bf16.mxu0 %v4493_v11  ;;  %1872 = vmatprep.subr.bf16.mxu1 %v4496_v12  ;;  %v5169_v55 = vpack.c.bf16 %v655_v35, %v651_v28  ;;  %v4515_v28 = vld [vmem:[#allocation3 + $0x340] ss:$16 sps:$4 sm:$0xff]  }
 0x141   : > { %v547_v27 = vpop.f32.mrb[16].mxu0  ;;  %1583 = vmatprep.mubr.bf16.mxu0 %v712_v21  ;;  %1809 = vmatprep.mubr.bf16.mxu1 %v712_v21  ;;  %v5171_v57 = vpack.c.bf16 %v657_v48, %v653_v31  ;;  %v4526_v31 = vld [vmem:[#allocation3 + $0x36c] ss:$16 sps:$4 sm:$0xff]  }
 0x142   : > { %v549_v30 = vpop.f32.mrb[17].mxu0  ;;  %1584 = vmatmul.mubr.bf16.gmra.mrb[44].mxu0 %v711_v19  ;;  %1810 = vmatmul.mubr.bf16.gmra.mrb[44].mxu1 %v711_v19  ;;  %v548_v40 = vadd.f32 %v547_v27, %v5106_v39  ;;  %v4520_v19 = vld [vmem:[#allocation3 + $0x34c] ss:$16 sps:$4 sm:$0xff]  }
 0x143   : > { %1647 = vmatpush1.bf16.msra.mxu0 %v4491_v22  ;;  %v551_v1 = vpop.f32.mrb[18].mxu0  ;;  %1873 = vmatpush1.bf16.msra.mxu1 %v4494_v23  ;;  %v550_v50 = vadd.f32 %v549_v30, %v5109_v41  ;;  %v660_v63 = vpop.f32.mrb[16].mxu1  ;;  %v4523_v30 = vld [vmem:[#allocation3 + $0x364] ss:$16 sps:$4 sm:$0xff]  }
 0x144   : > { %v552_v43 = vadd.f32 %v551_v1, %v5106_v39  ;;  %v553_v45 = vpop.f32.mrb[19].mxu0  ;;  %1648 = vmatprep.subr.bf16.mxu0 %v4499_v24  ;;  %1874 = vmatprep.subr.bf16.mxu1 %v4502_v25  ;;  %v661_v2 = vadd.f32 %v660_v63, %v5120_v51  ;;  %v662_v3 = vpop.f32.mrb[17].mxu1 }
 0x145   : > { %v554_v54 = vadd.f32 %v553_v45, %v5109_v41  ;;  %v663_v5 = vadd.f32 %v662_v3, %v5123_v53  ;;  %v664_v6 = vpop.f32.mrb[18].mxu1  ;;  %v4521_v45 = vld [vmem:[#allocation3 + $0x360] ss:$16 sps:$4 sm:$0xff]  }
 0x146   : > { %v715_v56 = vpack.c.bf16 %v552_v43, %v548_v40  ;;  %v665_v10 = vadd.f32 %v664_v6, %v5120_v51  ;;  %v666_v11 = vpop.f32.mrb[19].mxu1  ;;  %v4535_v6 = vld [vmem:[#allocation3 + $0x3a4] ss:$16 sps:$4 sm:$0xff]  }
 0x147   : > { %v716_v58 = vpack.c.bf16 %v554_v54, %v550_v50  ;;  %1649 = vmatpush1.bf16.msra.mxu0 %v4497_v33  ;;  %1875 = vmatpush1.bf16.msra.mxu1 %v4500_v34  ;;  %v667_v21 = vadd.f32 %v666_v11, %v5123_v53 }
 0x148   : > { %1650 = vmatprep.subr.bf16.mxu0 %v4505_v46  ;;  %1876 = vmatprep.subr.bf16.mxu1 %v4508_v47  ;;  %v5181_v24 = vpack.c.bf16 %v665_v10, %v661_v2  ;;  %v4524_v46 = vld [vmem:[#allocation3 + $0x368] ss:$16 sps:$4 sm:$0xff]  }
 0x149   : > { %v557_v0 = vpop.f32.mrb[20].mxu0  ;;  %1593 = vmatprep.mubr.bf16.mxu0 %v716_v58  ;;  %1819 = vmatprep.mubr.bf16.mxu1 %v716_v58  ;;  %v5183_v26 = vpack.c.bf16 %v667_v21, %v663_v5  ;;  %v4529_v58 = vld [vmem:[#allocation3 + $0x384] ss:$16 sps:$4 sm:$0xff]   ;;  %v4530_v5 = vld [vmem:[#allocation3 + $0x388] ss:$16 sps:$4 sm:$0xff]  }
 0x14a   : > { %v559_v4 = vpop.f32.mrb[21].mxu0  ;;  %1594 = vmatmul.mubr.bf16.gmra.mrb[48].mxu0 %v715_v56  ;;  %1820 = vmatmul.mubr.bf16.gmra.mrb[48].mxu1 %v715_v56  ;;  %v558_v12 = vadd.f32 %v557_v0, %v5106_v39  ;;  %v4536_v21 = vld [vmem:[#allocation3 + $0x3a8] ss:$16 sps:$4 sm:$0xff]  }
 0x14b   : > { %1651 = vmatpush1.bf16.msra.mxu0 %v4503_v59  ;;  %v561_v7 = vpop.f32.mrb[22].mxu0  ;;  %1877 = vmatpush1.bf16.msra.mxu1 %v4506_v60  ;;  %v560_v22 = vadd.f32 %v559_v4, %v5109_v41  ;;  %v670_v32 = vpop.f32.mrb[20].mxu1  ;;  %v4532_v59 = vld [vmem:[#allocation3 + $0x38c] ss:$16 sps:$4 sm:$0xff]   ;;  %v4527_v4 = vld [vmem:[#allocation3 + $0x380] ss:$16 sps:$4 sm:$0xff]  }
 0x14c   : > { %v562_v13 = vadd.f32 %v561_v7, %v5106_v39  ;;  %v563_v14 = vpop.f32.mrb[23].mxu0  ;;  %1652 = vmatprep.subr.bf16.mxu0 %v4511_v61  ;;  %1878 = vmatprep.subr.bf16.mxu1 %v4514_v62  ;;  %v671_v33 = vadd.f32 %v670_v32, %v5120_v51  ;;  %v672_v34 = vpop.f32.mrb[21].mxu1  ;;  %v4538_v7 = vld [vmem:[#allocation3 + $0x3ac] ss:$16 sps:$4 sm:$0xff]  }
 0x14d   : > { %v564_v23 = vadd.f32 %v563_v14, %v5109_v41  ;;  %v673_v37 = vadd.f32 %v672_v34, %v5123_v53  ;;  %v674_v40 = vpop.f32.mrb[22].mxu1 }
 0x14e   : > { %v719_v25 = vpack.c.bf16 %v562_v13, %v558_v12  ;;  %v675_v47 = vadd.f32 %v674_v40, %v5120_v51  ;;  %v676_v48 = vpop.f32.mrb[23].mxu1  ;;  %v4542_v40 = vld [vmem:[#allocation3 + $0x3c8] ss:$16 sps:$4 sm:$0xff]  }
 0x14f   : > { %v720_v27 = vpack.c.bf16 %v564_v23, %v560_v22  ;;  %1653 = vmatpush1.bf16.msra.mxu0 %v4509_v8  ;;  %1879 = vmatpush1.bf16.msra.mxu1 %v4512_v9  ;;  %v677_v60 = vadd.f32 %v676_v48, %v5123_v53 }
 0x150   : > { %1654 = vmatprep.subr.bf16.mxu0 %v4517_v15  ;;  %1880 = vmatprep.subr.bf16.mxu1 %v4520_v19  ;;  %v5193_v63 = vpack.c.bf16 %v675_v47, %v671_v33  ;;  %v4533_v19 = vld [vmem:[#allocation3 + $0x3a0] ss:$16 sps:$4 sm:$0xff]  }
 0x151   : > { %v567_v1 = vpop.f32.mrb[24].mxu0  ;;  %1603 = vmatprep.mubr.bf16.mxu0 %v720_v27  ;;  %1829 = vmatprep.mubr.bf16.mxu1 %v720_v27  ;;  %v5195_v2 = vpack.c.bf16 %v677_v60, %v673_v37 }
 0x152   : > { %v569_v35 = vpop.f32.mrb[25].mxu0  ;;  %1604 = vmatmul.mubr.bf16.gmra.mrb[52].mxu0 %v719_v25  ;;  %1830 = vmatmul.mubr.bf16.gmra.mrb[52].mxu1 %v719_v25  ;;  %v568_v50 = vadd.f32 %v567_v1, %v5106_v39 }
 0x153   : > { %1655 = vmatpush1.bf16.msra.mxu0 %v4515_v28  ;;  %v571_v43 = vpop.f32.mrb[26].mxu0  ;;  %1881 = vmatpush1.bf16.msra.mxu1 %v4518_v29  ;;  %v570_v61 = vadd.f32 %v569_v35, %v5109_v41  ;;  %v680_v8 = vpop.f32.mrb[24].mxu1  ;;  %v4541_v29 = vld [vmem:[#allocation3 + $0x3c4] ss:$16 sps:$4 sm:$0xff]  }
 0x154   : > { %v572_v54 = vadd.f32 %v571_v43, %v5106_v39  ;;  %v573_v56 = vpop.f32.mrb[27].mxu0  ;;  %1656 = vmatprep.subr.bf16.mxu0 %v4523_v30  ;;  %1882 = vmatprep.subr.bf16.mxu1 %v4526_v31  ;;  %v681_v10 = vadd.f32 %v680_v8, %v5120_v51  ;;  %v682_v11 = vpop.f32.mrb[25].mxu1  ;;  %v4544_v30 = vld [vmem:[#allocation3 + $0x3cc] ss:$16 sps:$4 sm:$0xff]   ;;  %v4547_v43 = vld [vmem:[#allocation3 + $0x3e4] ss:$16 sps:$4 sm:$0xff]  }
 0x155   : > { %v574_v62 = vadd.f32 %v573_v56, %v5109_v41  ;;  %v683_v13 = vadd.f32 %v682_v11, %v5123_v53  ;;  %v684_v14 = vpop.f32.mrb[26].mxu1  ;;  %v4548_v56 = vld [vmem:[#allocation3 + $0x3e8] ss:$16 sps:$4 sm:$0xff]   ;;  %v4568_v8 = vld [vmem:[#allocation5 + $0x4c] ss:$16 sps:$4 sm:$0xff]  }
 0x156   : > { %v723_v0 = vpack.c.bf16 %v572_v54, %v568_v50  ;;  %v685_v22 = vadd.f32 %v684_v14, %v5120_v51  ;;  %v686_v23 = vpop.f32.mrb[27].mxu1  ;;  %v4545_v54 = vld [vmem:[#allocation3 + $0x3e0] ss:$16 sps:$4 sm:$0xff]   ;;  %v4571_v11 = vld [vmem:[#allocation5 + $0x64] ss:$16 sps:$4 sm:$0xff]  }
 0x157   : > { %v724_v3 = vpack.c.bf16 %v574_v62, %v570_v61  ;;  %1657 = vmatpush1.bf16.msra.mxu0 %v4521_v45  ;;  %1883 = vmatpush1.bf16.msra.mxu1 %v4524_v46  ;;  %v687_v31 = vadd.f32 %v686_v23, %v5123_v53  ;;  %v4550_v46 = vld [vmem:[#allocation3 + $0x3ec] ss:$16 sps:$4 sm:$0xff]   ;;  %v4553_v61 = vld [vmem:[#allocation5 + $0x4] ss:$16 sps:$4 sm:$0xff]  }
 0x158   : > { %1658 = vmatprep.subr.bf16.mxu0 %v4529_v58  ;;  %1884 = vmatprep.subr.bf16.mxu1 %v4532_v59  ;;  %v5205_v33 = vpack.c.bf16 %v685_v22, %v681_v10  ;;  %v4556_v62 = vld [vmem:[#allocation5 + $0xc] ss:$16 sps:$4 sm:$0xff]   ;;  %v4566_v10 = vld [vmem:[#allocation5 + $0x48] ss:$16 sps:$4 sm:$0xff]   ;;  %v4589_v23 = vld [vmem:[#allocation5 + $0xc4] ss:$16 sps:$4 sm:$0xff]  }
 0x159   : > { %v577_v9 = vpop.f32.mrb[28].mxu0  ;;  %1613 = vmatprep.mubr.bf16.mxu0 %v724_v3  ;;  %1839 = vmatprep.mubr.bf16.mxu1 %v724_v3  ;;  %v5207_v35 = vpack.c.bf16 %v687_v31, %v683_v13  ;;  %v4577_v13 = vld [vmem:[#allocation5 + $0x84] ss:$16 sps:$4 sm:$0xff]   ;;  %v4580_v14 = vld [vmem:[#allocation5 + $0x8c] ss:$16 sps:$4 sm:$0xff]  }
 0x15a   : > { %v579_v12 = vpop.f32.mrb[29].mxu0  ;;  %1614 = vmatmul.mubr.bf16.gmra.mrb[56].mxu0 %v723_v0  ;;  %1840 = vmatmul.mubr.bf16.gmra.mrb[56].mxu1 %v723_v0  ;;  %v578_v25 = vadd.f32 %v577_v9, %v5106_v39  ;;  %v4563_v9 = vld [vmem:[#allocation5 + $0x40] ss:$16 sps:$4 sm:$0xff]   ;;  %v4584_v22 = vld [vmem:[#allocation5 + $0xa8] ss:$16 sps:$4 sm:$0xff]  }
 0x15b   : > { %1659 = vmatpush1.bf16.msra.mxu0 %v4527_v4  ;;  %v581_v15 = vpop.f32.mrb[30].mxu0  ;;  %1885 = vmatpush1.bf16.msra.mxu1 %v4530_v5  ;;  %v580_v32 = vadd.f32 %v579_v12, %v5109_v41  ;;  %v690_v45 = vpop.f32.mrb[28].mxu1  ;;  %v4551_v4 = vld [vmem:[#allocation5] ss:$16 sps:$4 sm:$0xff]   ;;  %v4559_v5 = vld [vmem:[#allocation5 + $0x24] ss:$16 sps:$4 sm:$0xff]  }
 0x15c   : > { %v582_v27 = vadd.f32 %v581_v15, %v5106_v39  ;;  %v583_v28 = vpop.f32.mrb[31].mxu0  ;;  %1660 = vmatprep.subr.bf16.mxu0 %v4535_v6  ;;  %1886 = vmatprep.subr.bf16.mxu1 %v4538_v7  ;;  %v4539_v39 = vld [vmem:[#allocation3 + $0x3c0] ss:$16 sps:$4 sm:$0xff]   ;;  %v691_v47 = vadd.f32 %v690_v45, %v5120_v51  ;;  %v4562_v6 = vld [vmem:[#allocation5 + $0x2c] ss:$16 sps:$4 sm:$0xff]  }
 0x15d   : > { %v584_v1 = vadd.f32 %v583_v28, %v5109_v41  ;;  %v692_v41 = vpop.f32.mrb[29].mxu1  ;;  %v4565_v7 = vld [vmem:[#allocation5 + $0x44] ss:$16 sps:$4 sm:$0xff]   ;;  %v4572_v12 = vld [vmem:[#allocation5 + $0x68] ss:$16 sps:$4 sm:$0xff]  }
 0x15e   : > { %v727_v34 = vpack.c.bf16 %v582_v27, %v578_v25  ;;  %v693_v48 = vadd.f32 %v692_v41, %v5123_v53  ;;  %v694_v50 = vpop.f32.mrb[30].mxu1  ;;  %v4575_v15 = vld [vmem:[#allocation5 + $0x80] ss:$16 sps:$4 sm:$0xff]   ;;  %v4592_v25 = vld [vmem:[#allocation5 + $0xcc] ss:$16 sps:$4 sm:$0xff]  }
 0x15f   : > { %v728_v37 = vpack.c.bf16 %v584_v1, %v580_v32  ;;  %1661 = vmatpush1.bf16.msra.mxu0 %v4533_v19  ;;  %1887 = vmatpush1.bf16.msra.mxu1 %v4536_v21  ;;  %v695_v58 = vadd.f32 %v694_v50, %v5120_v51  ;;  %v696_v59 = vpop.f32.mrb[31].mxu1  ;;  %v4554_v51 = vld [vmem:[#allocation5 + $0x8] ss:$16 sps:$4 sm:$0xff]   ;;  %v4583_v21 = vld [vmem:[#allocation5 + $0xa4] ss:$16 sps:$4 sm:$0xff]  }
 0x160   : > { %1662 = vmatprep.subr.bf16.mxu0 %v4541_v29  ;;  %1888 = vmatprep.subr.bf16.mxu1 %v4544_v30  ;;  %v697_v60 = vadd.f32 %v696_v59, %v5123_v53  ;;  %v4557_v53 = vld [vmem:[#allocation5 + $0x20] ss:$16 sps:$4 sm:$0xff]   ;;  %v4578_v19 = vld [vmem:[#allocation5 + $0x88] ss:$16 sps:$4 sm:$0xff]   ;;  %v4595_v29 = vld [vmem:[#allocation5 + $0xe4] ss:$16 sps:$4 sm:$0xff]  }
 0x161   : > { %1623 = vmatprep.mubr.bf16.mxu0 %v728_v37  ;;  %1849 = vmatprep.mubr.bf16.mxu1 %v728_v37  ;;  %v5215_v0 = vpack.c.bf16 %v695_v58, %v691_v47  ;;  %v4587_v27 = vld [vmem:[#allocation5 + $0xc0] ss:$16 sps:$4 sm:$0xff]   ;;  %v4590_v28 = vld [vmem:[#allocation5 + $0xc8] ss:$16 sps:$4 sm:$0xff]   ;;  %v4601_v31 = vld [vmem:[#allocation5 + $0x104] ss:$16 sps:$4 sm:$0xff]  }
 0x162   : > { %1624 = vmatmul.mubr.bf16.gmra.mrb[60].mxu0 %v727_v34  ;;  %1850 = vmatmul.mubr.bf16.gmra.mrb[60].mxu1 %v727_v34  ;;  %v5217_v3 = vpack.c.bf16 %v697_v60, %v693_v48  ;;  %v4596_v30 = vld [vmem:[#allocation5 + $0xe8] ss:$16 sps:$4 sm:$0xff]   ;;  %v4604_v32 = vld [vmem:[#allocation5 + $0x10c] ss:$16 sps:$4 sm:$0xff]   ;;  %v4599_v1 = vld [vmem:[#allocation5 + $0x100] ss:$16 sps:$4 sm:$0xff]  }
 0x163   : > { %1663 = vmatpush1.bf16.msra.mxu0 %v4539_v39  ;;  %1889 = vmatpush1.bf16.msra.mxu1 %v4542_v40  ;;  %v4602_v34 = vld [vmem:[#allocation5 + $0x108] ss:$16 sps:$4 sm:$0xff]   ;;  %v4607_v37 = vld [vmem:[#allocation5 + $0x124] ss:$16 sps:$4 sm:$0xff]   ;;  %v4611_v45 = vld [vmem:[#allocation5 + $0x140] ss:$16 sps:$4 sm:$0xff]  }
 0x164   : > { %1664 = vmatprep.subr.bf16.mxu0 %v4547_v43  ;;  %1666 = vmatprep.mubr.bf16.mxu0 %v5135_v18  ;;  %v4608_v39 = vld [vmem:[#allocation5 + $0x128] ss:$16 sps:$4 sm:$0xff]   ;;  %v4613_v40 = vld [vmem:[#allocation5 + $0x144] ss:$16 sps:$4 sm:$0xff]   ;;  %v4616_v43 = vld [vmem:[#allocation5 + $0x14c] ss:$16 sps:$4 sm:$0xff]  }
 0x165   : > { %1890 = vmatprep.subr.bf16.mxu1 %v4550_v46  ;;  %1892 = vmatprep.mubr.bf16.mxu1 %v5135_v18  ;;  %v4560_v18 = vld [vmem:[#allocation5 + $0x28] ss:$16 sps:$4 sm:$0xff]   ;;  %v4619_v47 = vld [vmem:[#allocation5 + $0x164] ss:$16 sps:$4 sm:$0xff]   ;;  %v4628_v50 = vld [vmem:[#allocation5 + $0x18c] ss:$16 sps:$4 sm:$0xff]  }
 0x166   : > { %v4614_v46 = vld [vmem:[#allocation5 + $0x148] ss:$16 sps:$4 sm:$0xff]   ;;  %v4625_v48 = vld [vmem:[#allocation5 + $0x184] ss:$16 sps:$4 sm:$0xff]  }
 0x167   : > { %1665 = vmatpush1.bf16.msra.mxu0 %v4545_v54  ;;  %1891 = vmatpush1.bf16.msra.mxu1 %v4548_v56  ;;  %v4620_v41 = vld [vmem:[#allocation5 + $0x168] ss:$16 sps:$4 sm:$0xff]   ;;  %v4623_v54 = vld [vmem:[#allocation5 + $0x180] ss:$16 sps:$4 sm:$0xff]   ;;  %v4631_v58 = vld [vmem:[#allocation5 + $0x1a4] ss:$16 sps:$4 sm:$0xff]  }
 0x168   : > { %2859 = vmatprep.subr.bf16.mxu0 %v4553_v61  ;;  %3085 = vmatprep.subr.bf16.mxu1 %v4556_v62  ;;  %v4626_v56 = vld [vmem:[#allocation5 + $0x188] ss:$16 sps:$4 sm:$0xff]   ;;  %v4637_v60 = vld [vmem:[#allocation5 + $0x1c4] ss:$16 sps:$4 sm:$0xff]   ;;  %v4640_v61 = vld [vmem:[#allocation5 + $0x1cc] ss:$16 sps:$4 sm:$0xff]  }
 0x169   : > { %v4632_v59 = vld [vmem:[#allocation5 + $0x1a8] ss:$16 sps:$4 sm:$0xff]   ;;  %v4635_v62 = vld [vmem:[#allocation5 + $0x1c0] ss:$16 sps:$4 sm:$0xff]  }
 0x16a   : > { %1667 = vmatmul.mubr.bf16.vlgmr.msra.gmra.mrb[32].mxu0 %v5133_v16  ;;  %1893 = vmatmul.mubr.bf16.vlgmr.msra.gmra.mrb[32].mxu1 %v5133_v16  ;;  %v4574_v16 = vld [vmem:[#allocation5 + $0x6c] ss:$16 sps:$4 sm:$0xff]  }
 0x16b   : > { %1676 = vmatprep.mubr.bf16.mxu0 %v5147_v52  ;;  %1902 = vmatprep.mubr.bf16.mxu1 %v5147_v52  ;;  %v4569_v52 = vld [vmem:[#allocation5 + $0x60] ss:$16 sps:$4 sm:$0xff]  }
 0x16c   : > { %2860 = vmatpush1.bf16.msra.mxu0 %v4551_v4  ;;  %3086 = vmatpush1.bf16.msra.mxu1 %v4554_v51  ;;  %v4646_v4 = vld [vmem:[#allocation5 + $0x1ec] ss:$16 sps:$4 sm:$0xff]   ;;  %v4641_v51 = vld [vmem:[#allocation5 + $0x1e0] ss:$16 sps:$4 sm:$0xff]  }
 0x16d   : > { %2861 = vmatprep.subr.bf16.mxu0 %v4559_v5  ;;  %3087 = vmatprep.subr.bf16.mxu1 %v4562_v6  ;;  %v4644_v5 = vld [vmem:[#allocation5 + $0x1e8] ss:$16 sps:$4 sm:$0xff]   ;;  %v4649_v6 = vld [vmem:[#allocation5 + $0x204] ss:$16 sps:$4 sm:$0xff]  }
 0x170   : > { %2862 = vmatpush1.bf16.msra.mxu0 %v4557_v53  ;;  %3088 = vmatpush1.bf16.msra.mxu1 %v4560_v18  ;;  %v4652_v53 = vld [vmem:[#allocation5 + $0x20c] ss:$16 sps:$4 sm:$0xff]  }
 0x171   : > { %2863 = vmatprep.subr.bf16.mxu0 %v4565_v7  ;;  %3089 = vmatprep.subr.bf16.mxu1 %v4568_v8 }
 0x172   : > { %1677 = vmatmul.mubr.bf16.gmra.mrb[36].mxu0 %v5145_v49  ;;  %1903 = vmatmul.mubr.bf16.gmra.mrb[36].mxu1 %v5145_v49  ;;  %v4586_v49 = vld [vmem:[#allocation5 + $0xac] ss:$16 sps:$4 sm:$0xff]  }
 0x173   : > { %1686 = vmatprep.mubr.bf16.mxu0 %v5159_v20  ;;  %1912 = vmatprep.mubr.bf16.mxu1 %v5159_v20  ;;  %v4581_v20 = vld [vmem:[#allocation5 + $0xa0] ss:$16 sps:$4 sm:$0xff]  }
 0x174   : > { %2864 = vmatpush1.bf16.msra.mxu0 %v4563_v9  ;;  %3090 = vmatpush1.bf16.msra.mxu1 %v4566_v10 }
 0x175   : > { %2865 = vmatprep.subr.bf16.mxu0 %v4571_v11  ;;  %3091 = vmatprep.subr.bf16.mxu1 %v4574_v16 }
 0x178   : > { %2866 = vmatpush1.bf16.msra.mxu0 %v4569_v52  ;;  %3092 = vmatpush1.bf16.msra.mxu1 %v4572_v12 }
 0x179   : > { %2867 = vmatprep.subr.bf16.mxu0 %v4577_v13  ;;  %3093 = vmatprep.subr.bf16.mxu1 %v4580_v14 }
 0x17a   : > { %1687 = vmatmul.mubr.bf16.gmra.mrb[40].mxu0 %v5157_v17  ;;  %1913 = vmatmul.mubr.bf16.gmra.mrb[40].mxu1 %v5157_v17  ;;  %v4598_v17 = vld [vmem:[#allocation5 + $0xec] ss:$16 sps:$4 sm:$0xff]  }
 0x17b   : > { %1696 = vmatprep.mubr.bf16.mxu0 %v5171_v57  ;;  %1922 = vmatprep.mubr.bf16.mxu1 %v5171_v57  ;;  %v4593_v57 = vld [vmem:[#allocation5 + $0xe0] ss:$16 sps:$4 sm:$0xff]  }
 0x17c   : > { %2868 = vmatpush1.bf16.msra.mxu0 %v4575_v15  ;;  %3094 = vmatpush1.bf16.msra.mxu1 %v4578_v19 }
 0x17d   : > { %2869 = vmatprep.subr.bf16.mxu0 %v4583_v21  ;;  %3095 = vmatprep.subr.bf16.mxu1 %v4586_v49 }
 0x180   : > { %2870 = vmatpush1.bf16.msra.mxu0 %v4581_v20  ;;  %3096 = vmatpush1.bf16.msra.mxu1 %v4584_v22 }
 0x181   : > { %2871 = vmatprep.subr.bf16.mxu0 %v4589_v23  ;;  %3097 = vmatprep.subr.bf16.mxu1 %v4592_v25 }
 0x182   : > { %1697 = vmatmul.mubr.bf16.gmra.mrb[44].mxu0 %v5169_v55  ;;  %1923 = vmatmul.mubr.bf16.gmra.mrb[44].mxu1 %v5169_v55  ;;  %v4610_v55 = vld [vmem:[#allocation5 + $0x12c] ss:$16 sps:$4 sm:$0xff]  }
 0x183   : > { %1706 = vmatprep.mubr.bf16.mxu0 %v5183_v26  ;;  %1932 = vmatprep.mubr.bf16.mxu1 %v5183_v26  ;;  %v4605_v26 = vld [vmem:[#allocation5 + $0x120] ss:$16 sps:$4 sm:$0xff]  }
 0x184   : > { %2872 = vmatpush1.bf16.msra.mxu0 %v4587_v27  ;;  %3098 = vmatpush1.bf16.msra.mxu1 %v4590_v28 }
 0x185   : > { %2873 = vmatprep.subr.bf16.mxu0 %v4595_v29  ;;  %3099 = vmatprep.subr.bf16.mxu1 %v4598_v17 }
 0x188   : > { %2874 = vmatpush1.bf16.msra.mxu0 %v4593_v57  ;;  %3100 = vmatpush1.bf16.msra.mxu1 %v4596_v30 }
 0x189   : > { %2875 = vmatprep.subr.bf16.mxu0 %v4601_v31  ;;  %3101 = vmatprep.subr.bf16.mxu1 %v4604_v32 }
 0x18a   : > { %1707 = vmatmul.mubr.bf16.gmra.mrb[48].mxu0 %v5181_v24  ;;  %1933 = vmatmul.mubr.bf16.gmra.mrb[48].mxu1 %v5181_v24  ;;  %v4622_v24 = vld [vmem:[#allocation5 + $0x16c] ss:$16 sps:$4 sm:$0xff]  }
 0x18b   : > { %1716 = vmatprep.mubr.bf16.mxu0 %v5195_v2  ;;  %1942 = vmatprep.mubr.bf16.mxu1 %v5195_v2  ;;  %v4617_v2 = vld [vmem:[#allocation5 + $0x160] ss:$16 sps:$4 sm:$0xff]  }
 0x18c   : > { %2876 = vmatpush1.bf16.msra.mxu0 %v4599_v1  ;;  %3102 = vmatpush1.bf16.msra.mxu1 %v4602_v34 }
 0x18d   : > { %2877 = vmatprep.subr.bf16.mxu0 %v4607_v37  ;;  %3103 = vmatprep.subr.bf16.mxu1 %v4610_v55 }
 0x190   : > { %2878 = vmatpush1.bf16.msra.mxu0 %v4605_v26  ;;  %3104 = vmatpush1.bf16.msra.mxu1 %v4608_v39 }
 0x191   : > { %2879 = vmatprep.subr.bf16.mxu0 %v4613_v40  ;;  %3105 = vmatprep.subr.bf16.mxu1 %v4616_v43  ;;  %v4647_v43 = vld [vmem:[#allocation5 + $0x200] ss:$16 sps:$4 sm:$0xff]  }
 0x192   : > { %1717 = vmatmul.mubr.bf16.gmra.mrb[52].mxu0 %v5193_v63  ;;  %1943 = vmatmul.mubr.bf16.gmra.mrb[52].mxu1 %v5193_v63  ;;  %v4634_v63 = vld [vmem:[#allocation5 + $0x1ac] ss:$16 sps:$4 sm:$0xff]  }
 0x193   : > { %1726 = vmatprep.mubr.bf16.mxu0 %v5207_v35  ;;  %1952 = vmatprep.mubr.bf16.mxu1 %v5207_v35  ;;  %v4629_v35 = vld [vmem:[#allocation5 + $0x1a0] ss:$16 sps:$4 sm:$0xff]  }
 0x194   : > { %2880 = vmatpush1.bf16.msra.mxu0 %v4611_v45  ;;  %3106 = vmatpush1.bf16.msra.mxu1 %v4614_v46  ;;  %v4650_v45 = vld [vmem:[#allocation5 + $0x208] ss:$16 sps:$4 sm:$0xff]  }
 0x195   : > { %2881 = vmatprep.subr.bf16.mxu0 %v4619_v47  ;;  %3107 = vmatprep.subr.bf16.mxu1 %v4622_v24 }
 0x198   : > { %2882 = vmatpush1.bf16.msra.mxu0 %v4617_v2  ;;  %3108 = vmatpush1.bf16.msra.mxu1 %v4620_v41  ;;  %v4655_v41 = vld [vmem:[#allocation5 + $0x224] ss:$16 sps:$4 sm:$0xff]  }
 0x199   : > { %2883 = vmatprep.subr.bf16.mxu0 %v4625_v48  ;;  %3109 = vmatprep.subr.bf16.mxu1 %v4628_v50  ;;  %v4658_v48 = vld [vmem:[#allocation5 + $0x22c] ss:$16 sps:$4 sm:$0xff]  }
 0x19a   : > { %1727 = vmatmul.mubr.bf16.gmra.mrb[56].mxu0 %v5205_v33  ;;  %1953 = vmatmul.mubr.bf16.gmra.mrb[56].mxu1 %v5205_v33  ;;  %v4638_v33 = vld [vmem:[#allocation5 + $0x1c8] ss:$16 sps:$4 sm:$0xff]  }
 0x19b   : > { %1736 = vmatprep.mubr.bf16.mxu0 %v5217_v3  ;;  %1962 = vmatprep.mubr.bf16.mxu1 %v5217_v3  ;;  %v4643_v3 = vld [vmem:[#allocation5 + $0x1e4] ss:$16 sps:$4 sm:$0xff]  }
 0x19c   : > { %2884 = vmatpush1.bf16.msra.mxu0 %v4623_v54  ;;  %3110 = vmatpush1.bf16.msra.mxu1 %v4626_v56 }
 0x19d   : > { %2885 = vmatprep.subr.bf16.mxu0 %v4631_v58  ;;  %3111 = vmatprep.subr.bf16.mxu1 %v4634_v63 }
 0x1a0   : > { %2886 = vmatpush1.bf16.msra.mxu0 %v4629_v35  ;;  %3112 = vmatpush1.bf16.msra.mxu1 %v4632_v59 }
 0x1a1   : > { %2887 = vmatprep.subr.bf16.mxu0 %v4637_v60  ;;  %3113 = vmatprep.subr.bf16.mxu1 %v4640_v61 }
 0x1a2   : > { %1737 = vmatmul.mubr.bf16.gmra.mrb[60].mxu0 %v5215_v0  ;;  %1963 = vmatmul.mubr.bf16.gmra.mrb[60].mxu1 %v5215_v0  ;;  %v859_v0 = vld [vmem:[%s5606_s4] sm:$0xf] }
 0x1a3   : > { %v5253_v18 = vrot.slane %v859_v0, %v5098_v36  ;;  %v5256_v7 = vrot.slane %v859_v0, %v5111_v42  ;;  %v5259_v8 = vrot.slane %v859_v0, %v5103_v38  ;;  %v5262_v9 = vrot.slane %v859_v0, %v5113_v44  ;;  %v4664_v0 = vld [vmem:[#allocation5 + $0x24c] ss:$16 sps:$4 sm:$0xff]  }
 0x1a4   : > { %2888 = vmatpush1.bf16.msra.mxu0 %v4635_v62  ;;  %3114 = vmatpush1.bf16.msra.mxu1 %v4638_v33  ;;  %v4653_v33 = vld [vmem:[#allocation5 + $0x220] ss:$16 sps:$4 sm:$0xff]  }
 0x1a5   : > { %2889 = vmatprep.subr.bf16.mxu0 %v4643_v3  ;;  %3115 = vmatprep.subr.bf16.mxu1 %v4646_v4  ;;  %v4656_v3 = vld [vmem:[#allocation5 + $0x228] ss:$16 sps:$4 sm:$0xff]   ;;  %v4661_v4 = vld [vmem:[#allocation5 + $0x244] ss:$16 sps:$4 sm:$0xff]  }
 0x1a8   : > { %2890 = vmatpush1.bf16.msra.mxu0 %v4641_v51  ;;  %3116 = vmatpush1.bf16.msra.mxu1 %v4644_v5 }
 0x1a9   : > { %2972 = vmatprep.subr.bf16.mxu0 %v4649_v6  ;;  %3198 = vmatprep.subr.bf16.mxu1 %v4652_v53 }
 0x23d   : > { %v1668_v10 = vpop.f32.mrb[32].mxu0  ;;  %v1894_v11 = vpop.f32.mrb[32].mxu1 }
 0x23e   : > { %v4065_v16 = vadd.f32 %v1668_v10, %v5253_v18  ;;  %v4097_v52 = vadd.f32 %v1894_v11, %v5256_v7  ;;  %v1670_v12 = vpop.f32.mrb[33].mxu0  ;;  %v1896_v13 = vpop.f32.mrb[33].mxu1 }
 0x23f   : > { %v4066_v14 = vadd.f32 %v1670_v12, %v5259_v8  ;;  %v4098_v15 = vadd.f32 %v1896_v13, %v5262_v9  ;;  %v1672_v19 = vpop.f32.mrb[34].mxu0  ;;  %v1898_v21 = vpop.f32.mrb[34].mxu1 }
 0x240   : > { %v4067_v49 = vadd.f32 %v1672_v19, %v5253_v18  ;;  %v4099_v20 = vadd.f32 %v1898_v21, %v5256_v7  ;;  %v1674_v22 = vpop.f32.mrb[35].mxu0  ;;  %v1900_v23 = vpop.f32.mrb[35].mxu1  ;;  %v1973_v28 = vmax.f32 %v4065_v16, 0.0  ;;  %v1975_v29 = vmax.f32 %v4097_v52, 0.0 }
 0x241   : > { %v4068_v25 = vadd.f32 %v1674_v22, %v5259_v8  ;;  %v4100_v27 = vadd.f32 %v1900_v23, %v5262_v9  ;;  %v1974_v30 = vmax.f32 %v4066_v14, 0.0  ;;  %v1976_v31 = vmax.f32 %v4098_v15, 0.0 }
 0x242   : > { %v1977_v17 = vmax.f32 %v4067_v49, 0.0  ;;  %v1979_v57 = vmax.f32 %v4099_v20, 0.0  ;;  %v4659_v49 = vld [vmem:[#allocation5 + $0x240] ss:$16 sps:$4 sm:$0xff]   ;;  %v4662_v20 = vld [vmem:[#allocation5 + $0x248] ss:$16 sps:$4 sm:$0xff]  }
 0x243   : > { %v1978_v32 = vmax.f32 %v4068_v25, 0.0  ;;  %v1980_v1 = vmax.f32 %v4100_v27, 0.0 }
 0x244   : > { %v2037_v34 = vpack.c.bf16 %v1977_v17, %v1973_v28  ;;  %v5272_v37 = vpack.c.bf16 %v1979_v57, %v1975_v29  ;;  %v4667_v28 = vld [vmem:[#allocation5 + $0x264] ss:$16 sps:$4 sm:$0xff]   ;;  %v4670_v29 = vld [vmem:[#allocation5 + $0x26c] ss:$16 sps:$4 sm:$0xff]  }
 0x245   : > { %v2038_v55 = vpack.c.bf16 %v1978_v32, %v1974_v30  ;;  %v5274_v26 = vpack.c.bf16 %v1980_v1, %v1976_v31  ;;  %v1678_v39 = vpop.f32.mrb[36].mxu0  ;;  %v1904_v40 = vpop.f32.mrb[36].mxu1 }
 0x246   : > { %v4069_v46 = vadd.f32 %v1678_v39, %v5253_v18  ;;  %v4101_v47 = vadd.f32 %v1904_v40, %v5256_v7  ;;  %v1680_v24 = vpop.f32.mrb[37].mxu0  ;;  %v1906_v2 = vpop.f32.mrb[37].mxu1 }
 0x247   : > { %v4070_v50 = vadd.f32 %v1680_v24, %v5259_v8  ;;  %v4102_v54 = vadd.f32 %v1906_v2, %v5262_v9  ;;  %v1682_v56 = vpop.f32.mrb[38].mxu0  ;;  %v1908_v58 = vpop.f32.mrb[38].mxu1  ;;  %2891 = vmatprep.mubr.bf16.mxu0 %v2038_v55  ;;  %3117 = vmatprep.mubr.bf16.mxu1 %v2038_v55 }
 0x248   : > { %v4071_v63 = vadd.f32 %v1682_v56, %v5253_v18  ;;  %v4103_v35 = vadd.f32 %v1908_v58, %v5256_v7  ;;  %v1684_v59 = vpop.f32.mrb[39].mxu0  ;;  %v1910_v60 = vpop.f32.mrb[39].mxu1  ;;  %2892 = vmatmul.mubr.bf16.vlgmr.msra.gmra.mrb[64].mxu0 %v2037_v34  ;;  %3118 = vmatmul.mubr.bf16.vlgmr.msra.gmra.mrb[64].mxu1 %v2037_v34  ;;  %v1981_v51 = vmax.f32 %v4069_v46, 0.0  ;;  %v1983_v5 = vmax.f32 %v4101_v47, 0.0  ;;  %v4673_v46 = vld [vmem:[#allocation5 + $0x284] ss:$16 sps:$4 sm:$0xff]  }
 0x249   : > { %v4072_v61 = vadd.f32 %v1684_v59, %v5259_v8  ;;  %v4104_v62 = vadd.f32 %v1910_v60, %v5262_v9  ;;  %2973 = vmatpush1.bf16.msra.mxu0 %v4647_v43  ;;  %3199 = vmatpush1.bf16.msra.mxu1 %v4650_v45  ;;  %v1982_v10 = vmax.f32 %v4070_v50, 0.0  ;;  %v1984_v11 = vmax.f32 %v4102_v54, 0.0  ;;  %v4665_v43 = vld [vmem:[#allocation5 + $0x260] ss:$16 sps:$4 sm:$0xff]   ;;  %v4668_v45 = vld [vmem:[#allocation5 + $0x268] ss:$16 sps:$4 sm:$0xff]  }
 0x24a   : > { %v1985_v6 = vmax.f32 %v4071_v63, 0.0  ;;  %v1987_v53 = vmax.f32 %v4103_v35, 0.0  ;;  %2974 = vmatprep.subr.bf16.mxu0 %v4655_v41  ;;  %3200 = vmatprep.subr.bf16.mxu1 %v4658_v48  ;;  %v4676_v48 = vld [vmem:[#allocation5 + $0x28c] ss:$16 sps:$4 sm:$0xff]  }
 0x24b   : > { %v1986_v16 = vmax.f32 %v4072_v61, 0.0  ;;  %v1988_v52 = vmax.f32 %v4104_v62, 0.0 }
 0x24c   : > { %v2041_v12 = vpack.c.bf16 %v1985_v6, %v1981_v51  ;;  %v5284_v13 = vpack.c.bf16 %v1987_v53, %v1983_v5  ;;  %v4679_v53 = vld [vmem:[#allocation5 + $0x2a4] ss:$16 sps:$4 sm:$0xff]  }
 0x24d   : > { %v2042_v14 = vpack.c.bf16 %v1986_v16, %v1982_v10  ;;  %v5286_v15 = vpack.c.bf16 %v1988_v52, %v1984_v11  ;;  %2975 = vmatpush1.bf16.msra.mxu0 %v4653_v33  ;;  %v1688_v19 = vpop.f32.mrb[40].mxu0  ;;  %v1914_v21 = vpop.f32.mrb[40].mxu1  ;;  %3201 = vmatpush1.bf16.msra.mxu1 %v4656_v3  ;;  %v4671_v33 = vld [vmem:[#allocation5 + $0x280] ss:$16 sps:$4 sm:$0xff]   ;;  %v4674_v3 = vld [vmem:[#allocation5 + $0x288] ss:$16 sps:$4 sm:$0xff]  }
 0x24e   : > { %v4073_v22 = vadd.f32 %v1688_v19, %v5253_v18  ;;  %v4105_v23 = vadd.f32 %v1914_v21, %v5256_v7  ;;  %v1690_v25 = vpop.f32.mrb[41].mxu0  ;;  %v1916_v27 = vpop.f32.mrb[41].mxu1  ;;  %2976 = vmatprep.subr.bf16.mxu0 %v4661_v4  ;;  %3202 = vmatprep.subr.bf16.mxu1 %v4664_v0  ;;  %v4682_v0 = vld [vmem:[#allocation5 + $0x2ac] ss:$16 sps:$4 sm:$0xff]  }
 0x24f   : > { %v4074_v17 = vadd.f32 %v1690_v25, %v5259_v8  ;;  %v4106_v57 = vadd.f32 %v1916_v27, %v5262_v9  ;;  %v1692_v30 = vpop.f32.mrb[42].mxu0  ;;  %v1918_v31 = vpop.f32.mrb[42].mxu1  ;;  %2901 = vmatprep.mubr.bf16.mxu0 %v2042_v14  ;;  %3127 = vmatprep.mubr.bf16.mxu1 %v2042_v14  ;;  %v4685_v25 = vld [vmem:[#allocation5 + $0x2c4] ss:$16 sps:$4 sm:$0xff]  }
 0x250   : > { %v4075_v32 = vadd.f32 %v1692_v30, %v5253_v18  ;;  %v4107_v1 = vadd.f32 %v1918_v31, %v5256_v7  ;;  %v1694_v34 = vpop.f32.mrb[43].mxu0  ;;  %v1920_v55 = vpop.f32.mrb[43].mxu1  ;;  %2902 = vmatmul.mubr.bf16.gmra.mrb[68].mxu0 %v2041_v12  ;;  %3128 = vmatmul.mubr.bf16.gmra.mrb[68].mxu1 %v2041_v12  ;;  %v1989_v47 = vmax.f32 %v4073_v22, 0.0  ;;  %v1991_v24 = vmax.f32 %v4105_v23, 0.0  ;;  %v4677_v22 = vld [vmem:[#allocation5 + $0x2a0] ss:$16 sps:$4 sm:$0xff]  }
 0x251   : > { %v4076_v39 = vadd.f32 %v1694_v34, %v5259_v8  ;;  %v4108_v40 = vadd.f32 %v1920_v55, %v5262_v9  ;;  %2977 = vmatpush1.bf16.msra.mxu0 %v4659_v49  ;;  %3203 = vmatpush1.bf16.msra.mxu1 %v4662_v20  ;;  %v1990_v50 = vmax.f32 %v4074_v17, 0.0  ;;  %v1992_v54 = vmax.f32 %v4106_v57, 0.0  ;;  %v4680_v23 = vld [vmem:[#allocation5 + $0x2a8] ss:$16 sps:$4 sm:$0xff]   ;;  %v4688_v57 = vld [vmem:[#allocation5 + $0x2cc] ss:$16 sps:$4 sm:$0xff]  }
 0x252   : > { %v1993_v2 = vmax.f32 %v4075_v32, 0.0  ;;  %v1995_v41 = vmax.f32 %v4107_v1, 0.0  ;;  %2978 = vmatprep.subr.bf16.mxu0 %v4667_v28  ;;  %3204 = vmatprep.subr.bf16.mxu1 %v4670_v29 }
 0x253   : > { %v1994_v56 = vmax.f32 %v4076_v39, 0.0  ;;  %v1996_v58 = vmax.f32 %v4108_v40, 0.0 }
 0x254   : > { %v2045_v63 = vpack.c.bf16 %v1993_v2, %v1989_v47  ;;  %v5296_v35 = vpack.c.bf16 %v1995_v41, %v1991_v24  ;;  %v4686_v47 = vld [vmem:[#allocation5 + $0x2c8] ss:$16 sps:$4 sm:$0xff]  }
 0x255   : > { %v2046_v59 = vpack.c.bf16 %v1994_v56, %v1990_v50  ;;  %v5298_v60 = vpack.c.bf16 %v1996_v58, %v1992_v54  ;;  %2979 = vmatpush1.bf16.msra.mxu0 %v4665_v43  ;;  %v1698_v61 = vpop.f32.mrb[44].mxu0  ;;  %v1924_v62 = vpop.f32.mrb[44].mxu1  ;;  %3205 = vmatpush1.bf16.msra.mxu1 %v4668_v45  ;;  %v4691_v50 = vld [vmem:[#allocation5 + $0x2e4] ss:$16 sps:$4 sm:$0xff]   ;;  %v4694_v54 = vld [vmem:[#allocation5 + $0x2ec] ss:$16 sps:$4 sm:$0xff]  }
 0x256   : > { %v4077_v4 = vadd.f32 %v1698_v61, %v5253_v18  ;;  %v4109_v51 = vadd.f32 %v1924_v62, %v5256_v7  ;;  %v1700_v5 = vpop.f32.mrb[45].mxu0  ;;  %v1926_v6 = vpop.f32.mrb[45].mxu1  ;;  %2980 = vmatprep.subr.bf16.mxu0 %v4673_v46  ;;  %3206 = vmatprep.subr.bf16.mxu1 %v4676_v48  ;;  %v4683_v46 = vld [vmem:[#allocation5 + $0x2c0] ss:$16 sps:$4 sm:$0xff]  }
 0x257   : > { %v4078_v10 = vadd.f32 %v1700_v5, %v5259_v8  ;;  %v4110_v11 = vadd.f32 %v1926_v6, %v5262_v9  ;;  %v1702_v16 = vpop.f32.mrb[46].mxu0  ;;  %v1928_v52 = vpop.f32.mrb[46].mxu1  ;;  %2911 = vmatprep.mubr.bf16.mxu0 %v2046_v59  ;;  %3137 = vmatprep.mubr.bf16.mxu1 %v2046_v59  ;;  %v4689_v5 = vld [vmem:[#allocation5 + $0x2e0] ss:$16 sps:$4 sm:$0xff]   ;;  %v4692_v6 = vld [vmem:[#allocation5 + $0x2e8] ss:$16 sps:$4 sm:$0xff]  }
 0x258   : > { %v4079_v12 = vadd.f32 %v1702_v16, %v5253_v18  ;;  %v4111_v14 = vadd.f32 %v1928_v52, %v5256_v7  ;;  %v1704_v19 = vpop.f32.mrb[47].mxu0  ;;  %v1930_v21 = vpop.f32.mrb[47].mxu1  ;;  %2912 = vmatmul.mubr.bf16.gmra.mrb[72].mxu0 %v2045_v63  ;;  %3138 = vmatmul.mubr.bf16.gmra.mrb[72].mxu1 %v2045_v63  ;;  %v1997_v27 = vmax.f32 %v4077_v4, 0.0  ;;  %v1999_v28 = vmax.f32 %v4109_v51, 0.0  ;;  %v4700_v52 = vld [vmem:[#allocation5 + $0x30c] ss:$16 sps:$4 sm:$0xff]  }
 0x259   : > { %v4080_v49 = vadd.f32 %v1704_v19, %v5259_v8  ;;  %v4112_v20 = vadd.f32 %v1930_v21, %v5262_v9  ;;  %2981 = vmatpush1.bf16.msra.mxu0 %v4671_v33  ;;  %3207 = vmatpush1.bf16.msra.mxu1 %v4674_v3  ;;  %v1998_v30 = vmax.f32 %v4078_v10, 0.0  ;;  %v2000_v31 = vmax.f32 %v4110_v11, 0.0 }
 0x25a   : > { %v2001_v29 = vmax.f32 %v4079_v12, 0.0  ;;  %v2003_v17 = vmax.f32 %v4111_v14, 0.0  ;;  %2982 = vmatprep.subr.bf16.mxu0 %v4679_v53  ;;  %3208 = vmatprep.subr.bf16.mxu1 %v4682_v0  ;;  %v4697_v53 = vld [vmem:[#allocation5 + $0x304] ss:$16 sps:$4 sm:$0xff]  }
 0x25b   : > { %v2002_v32 = vmax.f32 %v4080_v49, 0.0  ;;  %v2004_v1 = vmax.f32 %v4112_v20, 0.0 }
 0x25c   : > { %v2049_v34 = vpack.c.bf16 %v2001_v29, %v1997_v27  ;;  %v5308_v55 = vpack.c.bf16 %v2003_v17, %v1999_v28  ;;  %v4695_v28 = vld [vmem:[#allocation5 + $0x300] ss:$16 sps:$4 sm:$0xff]   ;;  %v4698_v29 = vld [vmem:[#allocation5 + $0x308] ss:$16 sps:$4 sm:$0xff]  }
 0x25d   : > { %v2050_v39 = vpack.c.bf16 %v2002_v32, %v1998_v30  ;;  %v5310_v40 = vpack.c.bf16 %v2004_v1, %v2000_v31  ;;  %2983 = vmatpush1.bf16.msra.mxu0 %v4677_v22  ;;  %v1708_v43 = vpop.f32.mrb[48].mxu0  ;;  %v1934_v45 = vpop.f32.mrb[48].mxu1  ;;  %3209 = vmatpush1.bf16.msra.mxu1 %v4680_v23  ;;  %v4703_v32 = vld [vmem:[#allocation5 + $0x324] ss:$16 sps:$4 sm:$0xff]   ;;  %v4706_v1 = vld [vmem:[#allocation5 + $0x32c] ss:$16 sps:$4 sm:$0xff]  }
 0x25e   : > { %v4081_v24 = vadd.f32 %v1708_v43, %v5253_v18  ;;  %v4113_v2 = vadd.f32 %v1934_v45, %v5256_v7  ;;  %v1710_v41 = vpop.f32.mrb[49].mxu0  ;;  %v1936_v48 = vpop.f32.mrb[49].mxu1  ;;  %2984 = vmatprep.subr.bf16.mxu0 %v4685_v25  ;;  %3210 = vmatprep.subr.bf16.mxu1 %v4688_v57 }
 0x25f   : > { %v4082_v56 = vadd.f32 %v1710_v41, %v5259_v8  ;;  %v4114_v58 = vadd.f32 %v1936_v48, %v5262_v9  ;;  %v1712_v63 = vpop.f32.mrb[50].mxu0  ;;  %v1938_v59 = vpop.f32.mrb[50].mxu1  ;;  %2921 = vmatprep.mubr.bf16.mxu0 %v2050_v39  ;;  %3147 = vmatprep.mubr.bf16.mxu1 %v2050_v39 }
 0x260   : > { %v4083_v61 = vadd.f32 %v1712_v63, %v5253_v18  ;;  %v4115_v62 = vadd.f32 %v1938_v59, %v5256_v7  ;;  %v1714_v33 = vpop.f32.mrb[51].mxu0  ;;  %v1940_v3 = vpop.f32.mrb[51].mxu1  ;;  %2922 = vmatmul.mubr.bf16.gmra.mrb[76].mxu0 %v2049_v34  ;;  %3148 = vmatmul.mubr.bf16.gmra.mrb[76].mxu1 %v2049_v34  ;;  %v2005_v0 = vmax.f32 %v4081_v24, 0.0  ;;  %v2007_v10 = vmax.f32 %v4113_v2, 0.0 }
 0x261   : > { %v4084_v4 = vadd.f32 %v1714_v33, %v5259_v8  ;;  %v4116_v51 = vadd.f32 %v1940_v3, %v5262_v9  ;;  %2985 = vmatpush1.bf16.msra.mxu0 %v4683_v46  ;;  %3211 = vmatpush1.bf16.msra.mxu1 %v4686_v47  ;;  %v2006_v12 = vmax.f32 %v4082_v56, 0.0  ;;  %v2008_v14 = vmax.f32 %v4114_v58, 0.0  ;;  %v4709_v56 = vld [vmem:[#allocation5 + $0x344] ss:$16 sps:$4 sm:$0xff]  }
 0x262   : > { %v2009_v11 = vmax.f32 %v4083_v61, 0.0  ;;  %v2011_v16 = vmax.f32 %v4115_v62, 0.0  ;;  %2986 = vmatprep.subr.bf16.mxu0 %v4691_v50  ;;  %3212 = vmatprep.subr.bf16.mxu1 %v4694_v54  ;;  %v4701_v50 = vld [vmem:[#allocation5 + $0x320] ss:$16 sps:$4 sm:$0xff]   ;;  %v4704_v54 = vld [vmem:[#allocation5 + $0x328] ss:$16 sps:$4 sm:$0xff]  }
 0x263   : > { %v2010_v19 = vmax.f32 %v4084_v4, 0.0  ;;  %v2012_v21 = vmax.f32 %v4116_v51, 0.0  ;;  %v4712_v62 = vld [vmem:[#allocation5 + $0x34c] ss:$16 sps:$4 sm:$0xff]  }
 0x264   : > { %v2053_v49 = vpack.c.bf16 %v2009_v11, %v2005_v0  ;;  %v5320_v20 = vpack.c.bf16 %v2011_v16, %v2007_v10  ;;  %v4707_v16 = vld [vmem:[#allocation5 + $0x340] ss:$16 sps:$4 sm:$0xff]  }
 0x265   : > { %v2054_v22 = vpack.c.bf16 %v2010_v19, %v2006_v12  ;;  %v5322_v23 = vpack.c.bf16 %v2012_v21, %v2008_v14  ;;  %2987 = vmatpush1.bf16.msra.mxu0 %v4689_v5  ;;  %v1718_v25 = vpop.f32.mrb[52].mxu0  ;;  %v1944_v27 = vpop.f32.mrb[52].mxu1  ;;  %3213 = vmatpush1.bf16.msra.mxu1 %v4692_v6 }
 0x266   : > { %v4085_v17 = vadd.f32 %v1718_v25, %v5253_v18  ;;  %v4117_v57 = vadd.f32 %v1944_v27, %v5256_v7  ;;  %v1720_v30 = vpop.f32.mrb[53].mxu0  ;;  %v1946_v31 = vpop.f32.mrb[53].mxu1  ;;  %2988 = vmatprep.subr.bf16.mxu0 %v4697_v53  ;;  %3214 = vmatprep.subr.bf16.mxu1 %v4700_v52  ;;  %v4710_v52 = vld [vmem:[#allocation5 + $0x348] ss:$16 sps:$4 sm:$0xff]  }
 0x267   : > { %v4086_v34 = vadd.f32 %v1720_v30, %v5259_v8  ;;  %v4118_v39 = vadd.f32 %v1946_v31, %v5262_v9  ;;  %v1722_v43 = vpop.f32.mrb[54].mxu0  ;;  %v1948_v45 = vpop.f32.mrb[54].mxu1  ;;  %2931 = vmatprep.mubr.bf16.mxu0 %v2054_v22  ;;  %3157 = vmatprep.mubr.bf16.mxu1 %v2054_v22  ;;  %v4718_v22 = vld [vmem:[#allocation5 + $0x36c] ss:$16 sps:$4 sm:$0xff]  }
 0x268   : > { %v4087_v46 = vadd.f32 %v1722_v43, %v5253_v18  ;;  %v4119_v47 = vadd.f32 %v1948_v45, %v5256_v7  ;;  %v1724_v24 = vpop.f32.mrb[55].mxu0  ;;  %v1950_v2 = vpop.f32.mrb[55].mxu1  ;;  %2932 = vmatmul.mubr.bf16.gmra.mrb[80].mxu0 %v2053_v49  ;;  %3158 = vmatmul.mubr.bf16.gmra.mrb[80].mxu1 %v2053_v49  ;;  %v2013_v58 = vmax.f32 %v4085_v17, 0.0  ;;  %v2015_v63 = vmax.f32 %v4117_v57, 0.0  ;;  %v4715_v49 = vld [vmem:[#allocation5 + $0x364] ss:$16 sps:$4 sm:$0xff]  }
 0x269   : > { %v4088_v41 = vadd.f32 %v1724_v24, %v5259_v8  ;;  %v4120_v48 = vadd.f32 %v1950_v2, %v5262_v9  ;;  %2989 = vmatpush1.bf16.msra.mxu0 %v4695_v28  ;;  %3215 = vmatpush1.bf16.msra.mxu1 %v4698_v29  ;;  %v2014_v33 = vmax.f32 %v4086_v34, 0.0  ;;  %v2016_v3 = vmax.f32 %v4118_v39, 0.0  ;;  %v4713_v34 = vld [vmem:[#allocation5 + $0x360] ss:$16 sps:$4 sm:$0xff]   ;;  %v4716_v39 = vld [vmem:[#allocation5 + $0x368] ss:$16 sps:$4 sm:$0xff]  }
 0x26a   : > { %v2017_v59 = vmax.f32 %v4087_v46, 0.0  ;;  %v2019_v61 = vmax.f32 %v4119_v47, 0.0  ;;  %2990 = vmatprep.subr.bf16.mxu0 %v4703_v32  ;;  %3216 = vmatprep.subr.bf16.mxu1 %v4706_v1  ;;  %v4721_v43 = vld [vmem:[#allocation5 + $0x384] ss:$16 sps:$4 sm:$0xff]   ;;  %v4724_v2 = vld [vmem:[#allocation5 + $0x38c] ss:$16 sps:$4 sm:$0xff]  }
 0x26b   : > { %v2018_v4 = vmax.f32 %v4088_v41, 0.0  ;;  %v2020_v51 = vmax.f32 %v4120_v48, 0.0 }
 0x26c   : > { %v2057_v5 = vpack.c.bf16 %v2017_v59, %v2013_v58  ;;  %v5332_v6 = vpack.c.bf16 %v2019_v61, %v2015_v63 }
 0x26d   : > { %v2058_v53 = vpack.c.bf16 %v2018_v4, %v2014_v33  ;;  %v5334_v0 = vpack.c.bf16 %v2020_v51, %v2016_v3  ;;  %2991 = vmatpush1.bf16.msra.mxu0 %v4701_v50  ;;  %v1728_v10 = vpop.f32.mrb[56].mxu0  ;;  %v1954_v11 = vpop.f32.mrb[56].mxu1  ;;  %3217 = vmatpush1.bf16.msra.mxu1 %v4704_v54  ;;  %v4719_v33 = vld [vmem:[#allocation5 + $0x380] ss:$16 sps:$4 sm:$0xff]   ;;  %v4722_v3 = vld [vmem:[#allocation5 + $0x388] ss:$16 sps:$4 sm:$0xff]  }
 0x26e   : > { %v4089_v12 = vadd.f32 %v1728_v10, %v5253_v18  ;;  %v4121_v14 = vadd.f32 %v1954_v11, %v5256_v7  ;;  %v1730_v19 = vpop.f32.mrb[57].mxu0  ;;  %v1956_v21 = vpop.f32.mrb[57].mxu1  ;;  %2992 = vmatprep.subr.bf16.mxu0 %v4709_v56  ;;  %3218 = vmatprep.subr.bf16.mxu1 %v4712_v62  ;;  %v4727_v10 = vld [vmem:[#allocation5 + $0x3a4] ss:$16 sps:$4 sm:$0xff]   ;;  %v4730_v11 = vld [vmem:[#allocation5 + $0x3ac] ss:$16 sps:$4 sm:$0xff]  }
 0x26f   : > { %v4090_v25 = vadd.f32 %v1730_v19, %v5259_v8  ;;  %v4122_v27 = vadd.f32 %v1956_v21, %v5262_v9  ;;  %v1732_v28 = vpop.f32.mrb[58].mxu0  ;;  %v1958_v29 = vpop.f32.mrb[58].mxu1  ;;  %2941 = vmatprep.mubr.bf16.mxu0 %v2058_v53  ;;  %3167 = vmatprep.mubr.bf16.mxu1 %v2058_v53 }
 0x270   : > { %v4091_v17 = vadd.f32 %v1732_v28, %v5253_v18  ;;  %v4123_v57 = vadd.f32 %v1958_v29, %v5256_v7  ;;  %v1734_v30 = vpop.f32.mrb[59].mxu0  ;;  %v1960_v31 = vpop.f32.mrb[59].mxu1  ;;  %2942 = vmatmul.mubr.bf16.gmra.mrb[84].mxu0 %v2057_v5  ;;  %3168 = vmatmul.mubr.bf16.gmra.mrb[84].mxu1 %v2057_v5  ;;  %v2021_v45 = vmax.f32 %v4089_v12, 0.0  ;;  %v2023_v46 = vmax.f32 %v4121_v14, 0.0  ;;  %v4725_v28 = vld [vmem:[#allocation5 + $0x3a0] ss:$16 sps:$4 sm:$0xff]  }
 0x271   : > { %v4092_v32 = vadd.f32 %v1734_v30, %v5259_v8  ;;  %v4124_v1 = vadd.f32 %v1960_v31, %v5262_v9  ;;  %2993 = vmatpush1.bf16.msra.mxu0 %v4707_v16  ;;  %3219 = vmatpush1.bf16.msra.mxu1 %v4710_v52  ;;  %v2022_v41 = vmax.f32 %v4090_v25, 0.0  ;;  %v2024_v48 = vmax.f32 %v4122_v27, 0.0  ;;  %v4728_v29 = vld [vmem:[#allocation5 + $0x3a8] ss:$16 sps:$4 sm:$0xff]  }
 0x272   : > { %v2025_v47 = vmax.f32 %v4091_v17, 0.0  ;;  %v2027_v24 = vmax.f32 %v4123_v57, 0.0  ;;  %2994 = vmatprep.subr.bf16.mxu0 %v4715_v49  ;;  %3220 = vmatprep.subr.bf16.mxu1 %v4718_v22  ;;  %v4733_v17 = vld [vmem:[#allocation5 + $0x3c4] ss:$16 sps:$4 sm:$0xff]  }
 0x273   : > { %v2026_v50 = vmax.f32 %v4092_v32, 0.0  ;;  %v2028_v54 = vmax.f32 %v4124_v1, 0.0 }
 0x274   : > { %v2061_v56 = vpack.c.bf16 %v2025_v47, %v2021_v45  ;;  %v5344_v58 = vpack.c.bf16 %v2027_v24, %v2023_v46  ;;  %v4731_v46 = vld [vmem:[#allocation5 + $0x3c0] ss:$16 sps:$4 sm:$0xff]   ;;  %v4734_v47 = vld [vmem:[#allocation5 + $0x3c8] ss:$16 sps:$4 sm:$0xff]   ;;  %v4739_v24 = vld [vmem:[#allocation5 + $0x3e4] ss:$16 sps:$4 sm:$0xff]  }
 0x275   : > { %v2062_v63 = vpack.c.bf16 %v2026_v50, %v2022_v41  ;;  %v5346_v59 = vpack.c.bf16 %v2028_v54, %v2024_v48  ;;  %2995 = vmatpush1.bf16.msra.mxu0 %v4713_v34  ;;  %v1738_v61 = vpop.f32.mrb[60].mxu0  ;;  %v1964_v62 = vpop.f32.mrb[60].mxu1  ;;  %3221 = vmatpush1.bf16.msra.mxu1 %v4716_v39  ;;  %v4737_v41 = vld [vmem:[#allocation5 + $0x3e0] ss:$16 sps:$4 sm:$0xff]   ;;  %v4740_v48 = vld [vmem:[#allocation5 + $0x3e8] ss:$16 sps:$4 sm:$0xff]  }
 0x276   : > { %v4093_v4 = vadd.f32 %v1738_v61, %v5253_v18  ;;  %v4125_v51 = vadd.f32 %v1964_v62, %v5256_v7  ;;  %v1740_v5 = vpop.f32.mrb[61].mxu0  ;;  %v1966_v53 = vpop.f32.mrb[61].mxu1  ;;  %2996 = vmatprep.subr.bf16.mxu0 %v4721_v43  ;;  %3222 = vmatprep.subr.bf16.mxu1 %v4724_v2  ;;  %v4742_v2 = vld [vmem:[#allocation5 + $0x3ec] ss:$16 sps:$4 sm:$0xff]  }
 0x277   : > { %v4094_v16 = vadd.f32 %v1740_v5, %v5259_v8  ;;  %v4126_v52 = vadd.f32 %v1966_v53, %v5262_v9  ;;  %v1742_v12 = vpop.f32.mrb[62].mxu0  ;;  %v1968_v14 = vpop.f32.mrb[62].mxu1  ;;  %2951 = vmatprep.mubr.bf16.mxu0 %v2062_v63  ;;  %3177 = vmatprep.mubr.bf16.mxu1 %v2062_v63 }
 0x278   : > { %v4095_v19 = vadd.f32 %v1742_v12, %v5253_v18  ;;  %v4127_v21 = vadd.f32 %v1968_v14, %v5256_v7  ;;  %v1744_v49 = vpop.f32.mrb[63].mxu0  ;;  %v1970_v22 = vpop.f32.mrb[63].mxu1  ;;  %2952 = vmatmul.mubr.bf16.gmra.mrb[88].mxu0 %v2061_v56  ;;  %3178 = vmatmul.mubr.bf16.gmra.mrb[88].mxu1 %v2061_v56  ;;  %v2029_v57 = vmax.f32 %v4093_v4, 0.0  ;;  %v2031_v30 = vmax.f32 %v4125_v51, 0.0  ;;  %v4736_v18 = vld [vmem:[#allocation5 + $0x3cc] ss:$16 sps:$4 sm:$0xff]  }
 0x279   : > { %v4096_v25 = vadd.f32 %v1744_v49, %v5259_v8  ;;  %v4128_v27 = vadd.f32 %v1970_v22, %v5262_v9  ;;  %2997 = vmatpush1.bf16.msra.mxu0 %v4719_v33  ;;  %3223 = vmatpush1.bf16.msra.mxu1 %v4722_v3  ;;  %v2030_v7 = vmax.f32 %v4094_v16, 0.0  ;;  %v2032_v1 = vmax.f32 %v4126_v52, 0.0 }
 0x27a   : > { %v2033_v31 = vmax.f32 %v4095_v19, 0.0  ;;  %v2035_v32 = vmax.f32 %v4127_v21, 0.0  ;;  %2998 = vmatprep.subr.bf16.mxu0 %v4727_v10  ;;  %3224 = vmatprep.subr.bf16.mxu1 %v4730_v11 }
 0x27b   : > { %v2034_v34 = vmax.f32 %v4096_v25, 0.0  ;;  %v2036_v39 = vmax.f32 %v4128_v27, 0.0 }
 0x27c   : > { %v2065_v43 = vpack.c.bf16 %v2033_v31, %v2029_v57  ;;  %v2067_v8 = vpack.c.bf16 %v2035_v32, %v2031_v30 }
 0x27d   : > { %v2066_v45 = vpack.c.bf16 %v2034_v34, %v2030_v7  ;;  %v2068_v9 = vpack.c.bf16 %v2036_v39, %v2032_v1  ;;  %2999 = vmatpush1.bf16.msra.mxu0 %v4725_v28  ;;  %3225 = vmatpush1.bf16.msra.mxu1 %v4728_v29 }
 0x27e   : > { %3000 = vmatprep.subr.bf16.mxu0 %v4733_v17  ;;  %3226 = vmatprep.subr.bf16.mxu1 %v4736_v18 }
 0x27f   : > { %2961 = vmatprep.mubr.bf16.mxu0 %v2066_v45  ;;  %3187 = vmatprep.mubr.bf16.mxu1 %v2066_v45 }
 0x280   : > { %2962 = vmatmul.mubr.bf16.gmra.mrb[92].mxu0 %v2065_v43  ;;  %3188 = vmatmul.mubr.bf16.gmra.mrb[92].mxu1 %v2065_v43 }
 0x281   : > { %3001 = vmatpush1.bf16.msra.mxu0 %v4731_v46  ;;  %3004 = vmatprep.mubr.bf16.mxu0 %v5274_v26 }
 0x282   : > { %3227 = vmatpush1.bf16.msra.mxu1 %v4734_v47  ;;  %3230 = vmatprep.mubr.bf16.mxu1 %v5274_v26 }
 0x283   : > { %3002 = vmatprep.subr.bf16.mxu0 %v4739_v24  ;;  %3228 = vmatprep.subr.bf16.mxu1 %v4742_v2 }
 0x285   : > { %3003 = vmatpush1.bf16.msra.mxu0 %v4737_v41 }
 0x286   : > { %3229 = vmatpush1.bf16.msra.mxu1 %v4740_v48 }
 0x288   : > { %3005 = vmatmul.mubr.bf16.vlgmr.msra.gmra.mrb[64].mxu0 %v5272_v37 }
 0x289   : > { %3231 = vmatmul.mubr.bf16.vlgmr.msra.gmra.mrb[64].mxu1 %v5272_v37  ;;  %3014 = vmatprep.mubr.bf16.mxu0 %v5286_v15  ;;  %v2197_v37 = vld [vmem:[%s5608_s6] sm:$0xf] }
 0x28a   : > { %3240 = vmatprep.mubr.bf16.mxu1 %v5286_v15  ;;  %v5388_v26 = vrot.slane %v2197_v37, %v5098_v36  ;;  %v5394_v15 = vrot.slane %v2197_v37, %v5111_v42 }
 0x290   : > { %3015 = vmatmul.mubr.bf16.gmra.mrb[68].mxu0 %v5284_v13 }
 0x291   : > { %3241 = vmatmul.mubr.bf16.gmra.mrb[68].mxu1 %v5284_v13  ;;  %3024 = vmatprep.mubr.bf16.mxu0 %v5298_v60  ;;  %v3375_v13 = vld [vmem:[%s5609_s7] sm:$0xf] }
 0x292   : > { %3250 = vmatprep.mubr.bf16.mxu1 %v5298_v60  ;;  %v5400_v60 = vrot.slane %v2197_v37, %v5113_v44  ;;  %v5409_v54 = vrot.slane %v3375_v13, %v5103_v38  ;;  %v5423_v14 = vrot.slane %v3375_v13, %v5113_v44 }
 0x298   : > { %3025 = vmatmul.mubr.bf16.gmra.mrb[72].mxu0 %v5296_v35 }
 0x299   : > { %3251 = vmatmul.mubr.bf16.gmra.mrb[72].mxu1 %v5296_v35  ;;  %3034 = vmatprep.mubr.bf16.mxu0 %v5310_v40  ;;  %v5397_v35 = vrot.slane %v2197_v37, %v5103_v38 }
 0x29a   : > { %3260 = vmatprep.mubr.bf16.mxu1 %v5310_v40 }
 0x2a0   : > { %3035 = vmatmul.mubr.bf16.gmra.mrb[76].mxu0 %v5308_v55 }
 0x2a1   : > { %3261 = vmatmul.mubr.bf16.gmra.mrb[76].mxu1 %v5308_v55  ;;  %3044 = vmatprep.mubr.bf16.mxu0 %v5322_v23 }
 0x2a2   : > { %3270 = vmatprep.mubr.bf16.mxu1 %v5322_v23 }
 0x2a8   : > { %3045 = vmatmul.mubr.bf16.gmra.mrb[80].mxu0 %v5320_v20 }
 0x2a9   : > { %3271 = vmatmul.mubr.bf16.gmra.mrb[80].mxu1 %v5320_v20  ;;  %3054 = vmatprep.mubr.bf16.mxu0 %v5334_v0  ;;  %v5404_v20 = vrot.slane %v3375_v13, %v5098_v36 }
 0x2aa   : > { %3280 = vmatprep.mubr.bf16.mxu1 %v5334_v0 }
 0x2b0   : > { %3055 = vmatmul.mubr.bf16.gmra.mrb[84].mxu0 %v5332_v6 }
 0x2b1   : > { %3281 = vmatmul.mubr.bf16.gmra.mrb[84].mxu1 %v5332_v6  ;;  %3064 = vmatprep.mubr.bf16.mxu0 %v5346_v59 }
 0x2b2   : > { %3290 = vmatprep.mubr.bf16.mxu1 %v5346_v59  ;;  %v5412_v59 = vrot.slane %v3375_v13, %v5111_v42 }
 0x2b8   : > { %3065 = vmatmul.mubr.bf16.gmra.mrb[88].mxu0 %v5344_v58 }
 0x2b9   : > { %3291 = vmatmul.mubr.bf16.gmra.mrb[88].mxu1 %v5344_v58  ;;  %3074 = vmatprep.mubr.bf16.mxu0 %v2068_v9 }
 0x2ba   : > { %3300 = vmatprep.mubr.bf16.mxu1 %v2068_v9 }
 0x2c0   : > { %3075 = vmatmul.mubr.bf16.gmra.mrb[92].mxu0 %v2067_v8 }
 0x2c1   : > { %3301 = vmatmul.mubr.bf16.gmra.mrb[92].mxu1 %v2067_v8 }
 0x35b   : > { %v3006_v55 = vpop.f32.mrb[64].mxu0 }
 0x35c   : > { %v4129_v40 = vadd.f32 %v3006_v55, %v5388_v26  ;;  %v3232_v23 = vpop.f32.mrb[64].mxu1  ;;  %v3008_v6 = vpop.f32.mrb[65].mxu0 }
 0x35d   : > { %v4161_v0 = vadd.f32 %v3232_v23, %v5394_v15  ;;  %v4130_v50 = vadd.f32 %v3008_v6, %v5397_v35  ;;  %v3234_v56 = vpop.f32.mrb[65].mxu1  ;;  %v3010_v58 = vpop.f32.mrb[66].mxu0 }
 0x35e   : > { %v3311_v63 = vmax.f32 %v4129_v40, 0.0  ;;  %v4162_v61 = vadd.f32 %v3234_v56, %v5400_v60  ;;  %v4131_v36 = vadd.f32 %v3010_v58, %v5388_v26  ;;  %v3236_v62 = vpop.f32.mrb[66].mxu1  ;;  %v3012_v33 = vpop.f32.mrb[67].mxu0 }
 0x35f   : > { %v3313_v3 = vmax.f32 %v4161_v0, 0.0  ;;  %v3312_v4 = vmax.f32 %v4130_v50, 0.0  ;;  %v4163_v51 = vadd.f32 %v3236_v62, %v5394_v15  ;;  %v4132_v5 = vadd.f32 %v3012_v33, %v5397_v35  ;;  %v3238_v38 = vpop.f32.mrb[67].mxu1 }
 0x360   : > { %v3397_v53 = vmul.f32 %v5404_v20, %v3311_v63  ;;  %v3315_v10 = vmax.f32 %v4131_v36, 0.0  ;;  %v4164_v11 = vadd.f32 %v3238_v38, %v5400_v60  ;;  %v3314_v52 = vmax.f32 %v4162_v61, 0.0 }
 0x361   : > { %v3398_v42 = vmul.f32 %v5409_v54, %v3312_v4  ;;  %v3316_v16 = vmax.f32 %v4132_v5, 0.0  ;;  %v3399_v19 = vmul.f32 %v5412_v59, %v3313_v3  ;;  %v3317_v21 = vmax.f32 %v4163_v51, 0.0 }
 0x362   : > { %v3401_v12 = vmul.f32 %v5404_v20, %v3315_v10  ;;  %v3318_v27 = vmax.f32 %v4164_v11, 0.0  ;;  %v3400_v8 = vmul.f32 %v5423_v14, %v3314_v52 }
 0x363   : > { %v3402_v49 = vmul.f32 %v5409_v54, %v3316_v16  ;;  %v3016_v22 = vpop.f32.mrb[68].mxu0  ;;  %v3461_v25 = vadd.f32 %v3398_v42, %v3397_v53  ;;  %v3403_v45 = vmul.f32 %v5412_v59, %v3317_v21 }
 0x364   : > { %v4133_v28 = vadd.f32 %v3016_v22, %v5388_v26  ;;  %v3242_v29 = vpop.f32.mrb[68].mxu1  ;;  %v3018_v17 = vpop.f32.mrb[69].mxu0  ;;  %v3404_v13 = vmul.f32 %v5423_v14, %v3318_v27 }
 0x365   : > { %v3466_v57 = vadd.f32 %v3402_v49, %v3401_v12  ;;  %v4165_v30 = vadd.f32 %v3242_v29, %v5394_v15  ;;  %v4134_v31 = vadd.f32 %v3018_v17, %v5397_v35  ;;  %v3244_v32 = vpop.f32.mrb[69].mxu1  ;;  %v3020_v44 = vpop.f32.mrb[70].mxu0  ;;  %v3462_v18 = vadd.f32 %v3461_v25, %v3399_v19 }
 0x366   : > { %v3319_v7 = vmax.f32 %v4133_v28, 0.0  ;;  %v4166_v1 = vadd.f32 %v3244_v32, %v5400_v60  ;;  %v4135_v34 = vadd.f32 %v3020_v44, %v5388_v26  ;;  %v3246_v39 = vpop.f32.mrb[70].mxu1  ;;  %v3022_v43 = vpop.f32.mrb[71].mxu0 }
 0x367   : > { %v3321_v9 = vmax.f32 %v4165_v30, 0.0  ;;  %v3320_v46 = vmax.f32 %v4134_v31, 0.0  ;;  %v4136_v47 = vadd.f32 %v3022_v43, %v5397_v35  ;;  %v3248_v24 = vpop.f32.mrb[71].mxu1  ;;  %v4167_v48 = vadd.f32 %v3246_v39, %v5394_v15 }
 0x368   : > { %v3405_v2 = vmul.f32 %v5404_v20, %v3319_v7  ;;  %v3323_v41 = vmax.f32 %v4135_v34, 0.0  ;;  %v4168_v37 = vadd.f32 %v3248_v24, %v5400_v60  ;;  %v3322_v23 = vmax.f32 %v4166_v1, 0.0 }
 0x369   : > { %v3406_v55 = vmul.f32 %v5409_v54, %v3320_v46  ;;  %v3324_v40 = vmax.f32 %v4136_v47, 0.0  ;;  %v3463_v0 = vadd.f32 %v3462_v18, %v3400_v8  ;;  %v3467_v50 = vadd.f32 %v3466_v57, %v3403_v45 }
 0x36a   : > { %v3409_v6 = vmul.f32 %v5404_v20, %v3323_v41  ;;  %v3407_v56 = vmul.f32 %v5412_v59, %v3321_v9  ;;  %v3325_v36 = vmax.f32 %v4167_v48, 0.0  ;;  %v3326_v62 = vmax.f32 %v4168_v37, 0.0 }
 0x36b   : > { %v3410_v58 = vmul.f32 %v5409_v54, %v3324_v40  ;;  %v3026_v63 = vpop.f32.mrb[72].mxu0  ;;  %v3471_v61 = vadd.f32 %v3406_v55, %v3405_v2  ;;  %3464 = vadd.xlane.f32.xlu0 %v3463_v0  ;;  %v3468_v51 = vadd.f32 %v3467_v50, %v3404_v13  ;;  %v3408_v49 = vmul.f32 %v5423_v14, %v3322_v23 }
 0x36c   : > { %v4137_v33 = vadd.f32 %v3026_v63, %v5388_v26  ;;  %v3252_v3 = vpop.f32.mrb[72].mxu1  ;;  %v3028_v4 = vpop.f32.mrb[73].mxu0  ;;  %v3411_v32 = vmul.f32 %v5412_v59, %v3325_v36  ;;  %v3412_v7 = vmul.f32 %v5423_v14, %v3326_v62 }
 0x36d   : > { %v3476_v5 = vadd.f32 %v3410_v58, %v3409_v6  ;;  %v4169_v38 = vadd.f32 %v3252_v3, %v5394_v15  ;;  %v4138_v53 = vadd.f32 %v3028_v4, %v5397_v35  ;;  %v3254_v10 = vpop.f32.mrb[73].mxu1  ;;  %v3030_v11 = vpop.f32.mrb[74].mxu0  ;;  %v3472_v42 = vadd.f32 %v3471_v61, %v3407_v56 }
 0x36e   : > { %v3327_v16 = vmax.f32 %v4137_v33, 0.0  ;;  %v4170_v52 = vadd.f32 %v3254_v10, %v5400_v60  ;;  %v4139_v12 = vadd.f32 %v3030_v11, %v5388_v26  ;;  %v3256_v19 = vpop.f32.mrb[74].mxu1  ;;  %v3032_v21 = vpop.f32.mrb[75].mxu0 }
 0x36f   : > { %v3329_v22 = vmax.f32 %v4169_v38, 0.0  ;;  %v3328_v25 = vmax.f32 %v4138_v53, 0.0  ;;  %v4171_v27 = vadd.f32 %v3256_v19, %v5394_v15  ;;  %v4140_v28 = vadd.f32 %v3032_v21, %v5397_v35  ;;  %v3258_v29 = vpop.f32.mrb[75].mxu1  ;;  %3469 = vadd.xlane.f32.xlu0 %v3468_v51 }
 0x370   : > { %v3413_v17 = vmul.f32 %v5404_v20, %v3327_v16  ;;  %v3330_v57 = vmax.f32 %v4170_v52, 0.0  ;;  %v3331_v30 = vmax.f32 %v4139_v12, 0.0  ;;  %v4172_v31 = vadd.f32 %v3258_v29, %v5400_v60 }
 0x371   : > { %v3414_v44 = vmul.f32 %v5409_v54, %v3328_v25  ;;  %v3332_v18 = vmax.f32 %v4140_v28, 0.0  ;;  %v3473_v34 = vadd.f32 %v3472_v42, %v3408_v49  ;;  %v3415_v39 = vmul.f32 %v5412_v59, %v3329_v22 }
 0x372   : > { %v3417_v1 = vmul.f32 %v5404_v20, %v3331_v30  ;;  %v3477_v9 = vadd.f32 %v3476_v5, %v3411_v32  ;;  %v3416_v46 = vmul.f32 %v5423_v14, %v3330_v57  ;;  %v3333_v47 = vmax.f32 %v4171_v27, 0.0 }
 0x373   : > { %v3481_v43 = vadd.f32 %v3414_v44, %v3413_v17  ;;  %v3418_v8 = vmul.f32 %v5409_v54, %v3332_v18  ;;  %v3036_v45 = vpop.f32.mrb[76].mxu0  ;;  %v3334_v24 = vmax.f32 %v4172_v31, 0.0  ;;  %3474 = vadd.xlane.f32.xlu1 %v3473_v34 }
 0x374   : > { %v4141_v2 = vadd.f32 %v3036_v45, %v5388_v26  ;;  %v3262_v41 = vpop.f32.mrb[76].mxu1  ;;  %v3038_v48 = vpop.f32.mrb[77].mxu0  ;;  %v3478_v6 = vadd.f32 %v3477_v9, %v3412_v7  ;;  %v3419_v10 = vmul.f32 %v5412_v59, %v3333_v47 }
 0x375   : > { %v3486_v37 = vadd.f32 %v3418_v8, %v3417_v1  ;;  %v4173_v13 = vadd.f32 %v3262_v41, %v5394_v15  ;;  %v4142_v55 = vadd.f32 %v3038_v48, %v5397_v35  ;;  %v3264_v40 = vpop.f32.mrb[77].mxu1  ;;  %v3040_v23 = vpop.f32.mrb[78].mxu0  ;;  %v3482_v61 = vadd.f32 %v3481_v43, %v3415_v39 }
 0x376   : > { %v3335_v0 = vmax.f32 %v4141_v2, 0.0  ;;  %v4174_v50 = vadd.f32 %v3264_v40, %v5400_v60  ;;  %v4143_v56 = vadd.f32 %v3040_v23, %v5388_v26  ;;  %v3266_v58 = vpop.f32.mrb[78].mxu1  ;;  %v3042_v63 = vpop.f32.mrb[79].mxu0  ;;  %v3420_v16 = vmul.f32 %v5423_v14, %v3334_v24 }
 0x377   : > { %v3337_v36 = vmax.f32 %v4173_v13, 0.0  ;;  %v3336_v62 = vmax.f32 %v4142_v55, 0.0  ;;  %v4175_v33 = vadd.f32 %v3266_v58, %v5394_v15  ;;  %v4144_v3 = vadd.f32 %v3042_v63, %v5397_v35  ;;  %v3268_v4 = vpop.f32.mrb[79].mxu1  ;;  %3479 = vadd.xlane.f32.xlu1 %v3478_v6 }
 0x378   : > { %v3421_v51 = vmul.f32 %v5404_v20, %v3335_v0  ;;  %v3338_v5 = vmax.f32 %v4174_v50, 0.0  ;;  %v3339_v38 = vmax.f32 %v4143_v56, 0.0  ;;  %v4176_v53 = vadd.f32 %v3268_v4, %v5400_v60 }
 0x379   : > { %v3422_v11 = vmul.f32 %v5409_v54, %v3336_v62  ;;  %v3340_v42 = vmax.f32 %v4144_v3, 0.0  ;;  %v3483_v12 = vadd.f32 %v3482_v61, %v3416_v46  ;;  %v3423_v19 = vmul.f32 %v5412_v59, %v3337_v36 }
 0x37a   : > { %v3425_v52 = vmul.f32 %v5404_v20, %v3339_v38  ;;  %v3487_v25 = vadd.f32 %v3486_v37, %v3419_v10  ;;  %v3424_v27 = vmul.f32 %v5423_v14, %v3338_v5  ;;  %v3341_v28 = vmax.f32 %v4175_v33, 0.0 }
 0x37b   : > { %v3491_v21 = vadd.f32 %v3422_v11, %v3421_v51  ;;  %v3426_v49 = vmul.f32 %v5409_v54, %v3340_v42  ;;  %v3046_v22 = vpop.f32.mrb[80].mxu0  ;;  %v3342_v29 = vmax.f32 %v4176_v53, 0.0  ;;  %3484 = vadd.xlane.f32.xlu0 %v3483_v12 }
 0x37c   : > { %v4145_v17 = vadd.f32 %v3046_v22, %v5388_v26  ;;  %v3272_v57 = vpop.f32.mrb[80].mxu1  ;;  %v3048_v30 = vpop.f32.mrb[81].mxu0  ;;  %v3488_v44 = vadd.f32 %v3487_v25, %v3420_v16  ;;  %v3427_v40 = vmul.f32 %v5412_v59, %v3341_v28 }
 0x37d   : > { %v3496_v31 = vadd.f32 %v3426_v49, %v3425_v52  ;;  %v4177_v32 = vadd.f32 %v3272_v57, %v5394_v15  ;;  %v4146_v18 = vadd.f32 %v3048_v30, %v5397_v35  ;;  %v3274_v7 = vpop.f32.mrb[81].mxu1  ;;  %v3050_v1 = vpop.f32.mrb[82].mxu0  ;;  %v3492_v9 = vadd.f32 %v3491_v21, %v3423_v19 }
 0x37e   : > { %v3343_v34 = vmax.f32 %v4145_v17, 0.0  ;;  %v4178_v39 = vadd.f32 %v3274_v7, %v5400_v60  ;;  %v4147_v43 = vadd.f32 %v3050_v1, %v5388_v26  ;;  %v3276_v8 = vpop.f32.mrb[82].mxu1  ;;  %v3052_v45 = vpop.f32.mrb[83].mxu0  ;;  %3489 = vadd.xlane.f32.xlu1 %v3488_v44  ;;  %v3428_v0 = vmul.f32 %v5423_v14, %v3342_v29 }
 0x37f   : > { %v3345_v46 = vmax.f32 %v4177_v32, 0.0  ;;  %v3344_v47 = vmax.f32 %v4146_v18, 0.0  ;;  %v4179_v24 = vadd.f32 %v3276_v8, %v5394_v15  ;;  %v4148_v2 = vadd.f32 %v3052_v45, %v5397_v35  ;;  %v3278_v41 = vpop.f32.mrb[83].mxu1 }
 0x380   : > { %v3429_v48 = vmul.f32 %v5404_v20, %v3343_v34  ;;  %v3346_v37 = vmax.f32 %v4178_v39, 0.0  ;;  %v3347_v13 = vmax.f32 %v4147_v43, 0.0  ;;  %v4180_v55 = vadd.f32 %v3278_v41, %v5400_v60 }
 0x381   : > { %v3430_v23 = vmul.f32 %v5409_v54, %v3344_v47  ;;  %v3348_v6 = vmax.f32 %v4148_v2, 0.0  ;;  %v3493_v56 = vadd.f32 %v3492_v9, %v3424_v27  ;;  %v3431_v58 = vmul.f32 %v5412_v59, %v3345_v46 }
 0x382   : > { %v3433_v50 = vmul.f32 %v5404_v20, %v3347_v13  ;;  %v3497_v62 = vadd.f32 %v3496_v31, %v3427_v40  ;;  %v3432_v33 = vmul.f32 %v5423_v14, %v3346_v37  ;;  %v3349_v3 = vmax.f32 %v4179_v24, 0.0 }
 0x383   : > { %v3501_v63 = vadd.f32 %v3430_v23, %v3429_v48  ;;  %v3434_v61 = vmul.f32 %v5409_v54, %v3348_v6  ;;  %v3056_v36 = vpop.f32.mrb[84].mxu0  ;;  %v3350_v4 = vmax.f32 %v4180_v55, 0.0  ;;  %3494 = vadd.xlane.f32.xlu0 %v3493_v56 }
 0x384   : > { %v4149_v51 = vadd.f32 %v3056_v36, %v5388_v26  ;;  %v3282_v5 = vpop.f32.mrb[84].mxu1  ;;  %v3058_v38 = vpop.f32.mrb[85].mxu0  ;;  %v3498_v11 = vadd.f32 %v3497_v62, %v3428_v0  ;;  %v3435_v18 = vmul.f32 %v5412_v59, %v3349_v3 }
 0x385   : > { %v3506_v53 = vadd.f32 %v3434_v61, %v3433_v50  ;;  %v4181_v10 = vadd.f32 %v3282_v5, %v5394_v15  ;;  %v4150_v42 = vadd.f32 %v3058_v38, %v5397_v35  ;;  %v3284_v16 = vpop.f32.mrb[85].mxu1  ;;  %v3060_v52 = vpop.f32.mrb[86].mxu0  ;;  %v3502_v25 = vadd.f32 %v3501_v63, %v3431_v58 }
 0x386   : > { %v3351_v12 = vmax.f32 %v4149_v51, 0.0  ;;  %v4182_v19 = vadd.f32 %v3284_v16, %v5400_v60  ;;  %v4151_v21 = vadd.f32 %v3060_v52, %v5388_v26  ;;  %v3286_v49 = vpop.f32.mrb[86].mxu1  ;;  %v3062_v22 = vpop.f32.mrb[87].mxu0  ;;  %3499 = vadd.xlane.f32.xlu1 %v3498_v11  ;;  %v3436_v34 = vmul.f32 %v5423_v14, %v3350_v4 }
 0x387   : > { %v3353_v27 = vmax.f32 %v4181_v10, 0.0  ;;  %v3352_v28 = vmax.f32 %v4150_v42, 0.0  ;;  %v4183_v29 = vadd.f32 %v3286_v49, %v5394_v15  ;;  %v4152_v17 = vadd.f32 %v3062_v22, %v5397_v35  ;;  %v3288_v57 = vpop.f32.mrb[87].mxu1 }
 0x388   : > { %v3437_v30 = vmul.f32 %v5404_v20, %v3351_v12  ;;  %v3354_v31 = vmax.f32 %v4182_v19, 0.0  ;;  %v3355_v32 = vmax.f32 %v4151_v21, 0.0  ;;  %v4184_v44 = vadd.f32 %v3288_v57, %v5400_v60 }
 0x389   : > { %v3438_v7 = vmul.f32 %v5409_v54, %v3352_v28  ;;  %v3356_v1 = vmax.f32 %v4152_v17, 0.0  ;;  %v3503_v43 = vadd.f32 %v3502_v25, %v3432_v33  ;;  %v3439_v8 = vmul.f32 %v5412_v59, %v3353_v27 }
 0x38a   : > { %v3441_v39 = vmul.f32 %v5404_v20, %v3355_v32  ;;  %v3507_v47 = vadd.f32 %v3506_v53, %v3435_v18  ;;  %v3440_v24 = vmul.f32 %v5423_v14, %v3354_v31  ;;  %v3357_v2 = vmax.f32 %v4183_v29, 0.0 }
 0x38b   : > { %v3511_v45 = vadd.f32 %v3438_v7, %v3437_v30  ;;  %v3442_v9 = vmul.f32 %v5409_v54, %v3356_v1  ;;  %v3066_v46 = vpop.f32.mrb[88].mxu0  ;;  %v3358_v41 = vmax.f32 %v4184_v44, 0.0  ;;  %3504 = vadd.xlane.f32.xlu0 %v3503_v43 }
 0x38c   : > { %v4153_v48 = vadd.f32 %v3066_v46, %v5388_v26  ;;  %v3292_v37 = vpop.f32.mrb[88].mxu1  ;;  %v3068_v13 = vpop.f32.mrb[89].mxu0  ;;  %v3508_v23 = vadd.f32 %v3507_v47, %v3436_v34  ;;  %v3443_v42 = vmul.f32 %v5412_v59, %v3357_v2 }
 0x38d   : > { %v3516_v55 = vadd.f32 %v3442_v9, %v3441_v39  ;;  %v4185_v40 = vadd.f32 %v3292_v37, %v5394_v15  ;;  %v4154_v6 = vadd.f32 %v3068_v13, %v5397_v35  ;;  %v3294_v0 = vpop.f32.mrb[89].mxu1  ;;  %v3070_v50 = vpop.f32.mrb[90].mxu0  ;;  %v3512_v62 = vadd.f32 %v3511_v45, %v3439_v8 }
 0x38e   : > { %v3359_v56 = vmax.f32 %v4153_v48, 0.0  ;;  %v4186_v58 = vadd.f32 %v3294_v0, %v5400_v60  ;;  %v4155_v63 = vadd.f32 %v3070_v50, %v5388_v26  ;;  %v3296_v61 = vpop.f32.mrb[90].mxu1  ;;  %v3072_v36 = vpop.f32.mrb[91].mxu0  ;;  %3509 = vadd.xlane.f32.xlu1 %v3508_v23  ;;  %v3444_v12 = vmul.f32 %v5423_v14, %v3358_v41 }
 0x38f   : > { %v3361_v33 = vmax.f32 %v4185_v40, 0.0  ;;  %v3360_v3 = vmax.f32 %v4154_v6, 0.0  ;;  %v4187_v4 = vadd.f32 %v3296_v61, %v5394_v15  ;;  %v4156_v51 = vadd.f32 %v3072_v36, %v5397_v35  ;;  %v3298_v5 = vpop.f32.mrb[91].mxu1 }
 0x390   : > { %v3445_v38 = vmul.f32 %v5404_v20, %v3359_v56  ;;  %v3362_v53 = vmax.f32 %v4186_v58, 0.0  ;;  %v3363_v10 = vmax.f32 %v4155_v63, 0.0  ;;  %v4188_v11 = vadd.f32 %v3298_v5, %v5400_v60 }
 0x391   : > { %v3446_v16 = vmul.f32 %v5409_v54, %v3360_v3  ;;  %v3364_v52 = vmax.f32 %v4156_v51, 0.0  ;;  %v3513_v21 = vadd.f32 %v3512_v62, %v3440_v24  ;;  %v3447_v49 = vmul.f32 %v5412_v59, %v3361_v33 }
 0x392   : > { %v3449_v19 = vmul.f32 %v5404_v20, %v3363_v10  ;;  %v3517_v28 = vadd.f32 %v3516_v55, %v3443_v42  ;;  %v3448_v29 = vmul.f32 %v5423_v14, %v3362_v53  ;;  %v3365_v17 = vmax.f32 %v4187_v4, 0.0  ;;  %v5542_v10 = vld [vmem:[#allocation2] ss:$0 sm:$0xff] }
 0x393   : > { %v3521_v22 = vadd.f32 %v3446_v16, %v3445_v38  ;;  %v3450_v25 = vmul.f32 %v5409_v54, %v3364_v52  ;;  %v3076_v27 = vpop.f32.mrb[92].mxu0  ;;  %v3366_v57 = vmax.f32 %v4188_v11, 0.0  ;;  %3514 = vadd.xlane.f32.xlu0 %v3513_v21 }
 0x394   : > { %v4157_v30 = vadd.f32 %v3076_v27, %v5388_v26  ;;  %v3302_v31 = vpop.f32.mrb[92].mxu1  ;;  %v3078_v32 = vpop.f32.mrb[93].mxu0  ;;  %v3518_v7 = vadd.f32 %v3517_v28, %v3444_v12  ;;  %v3451_v6 = vmul.f32 %v5412_v59, %v3365_v17 }
 0x395   : > { %v3526_v44 = vadd.f32 %v3450_v25, %v3449_v19  ;;  %v4189_v18 = vadd.f32 %v3302_v31, %v5394_v15  ;;  %v4158_v1 = vadd.f32 %v3078_v32, %v5397_v35  ;;  %v3304_v34 = vpop.f32.mrb[93].mxu1  ;;  %v3080_v39 = vpop.f32.mrb[94].mxu0  ;;  %v3522_v47 = vadd.f32 %v3521_v22, %v3447_v49 }
 0x396   : > { %v3367_v43 = vmax.f32 %v4157_v30, 0.0  ;;  %v4190_v8 = vadd.f32 %v3304_v34, %v5400_v60  ;;  %v4159_v45 = vadd.f32 %v3080_v39, %v5388_v26  ;;  %v3306_v9 = vpop.f32.mrb[94].mxu1  ;;  %v3082_v46 = vpop.f32.mrb[95].mxu0  ;;  %3519 = vadd.xlane.f32.xlu1 %v3518_v7  ;;  %v3452_v56 = vmul.f32 %v5423_v14, %v3366_v57 }
 0x397   : > { %v3369_v24 = vmax.f32 %v4189_v18, 0.0  ;;  %v3368_v2 = vmax.f32 %v4158_v1, 0.0  ;;  %v4191_v41 = vadd.f32 %v3306_v9, %v5394_v15  ;;  %v4160_v48 = vadd.f32 %v3082_v46, %v5397_v35  ;;  %v3308_v37 = vpop.f32.mrb[95].mxu1 }
 0x398   : > { %v3453_v13 = vmul.f32 %v5404_v20, %v3367_v43  ;;  %v3370_v55 = vmax.f32 %v4190_v8, 0.0  ;;  %v3371_v40 = vmax.f32 %v4159_v45, 0.0  ;;  %v4192_v23 = vadd.f32 %v3308_v37, %v5400_v60 }
 0x399   : > { %v3454_v26 = vmul.f32 %v5409_v54, %v3368_v2  ;;  %v3373_v0 = vmax.f32 %v4191_v41, 0.0  ;;  %v3372_v50 = vmax.f32 %v4160_v48, 0.0  ;;  %v3455_v58 = vmul.f32 %v5412_v59, %v3369_v24 }
 0x39a   : > { %v3457_v15 = vmul.f32 %v5404_v20, %v3371_v40  ;;  %v3523_v35 = vadd.f32 %v3522_v47, %v3448_v29  ;;  %v3374_v36 = vmax.f32 %v4192_v23, 0.0  ;;  %v3527_v62 = vadd.f32 %v3526_v44, %v3451_v6 }
 0x39b   : > { %v3531_v63 = vadd.f32 %v3454_v26, %v3453_v13  ;;  %v3458_v61 = vmul.f32 %v5409_v54, %v3372_v50  ;;  %v3456_v60 = vmul.f32 %v5423_v14, %v3370_v55  ;;  %v3459_v33 = vmul.f32 %v5412_v59, %v3373_v0 }
 0x39c   : > { %3524 = vadd.xlane.f32.xlu0 %v3523_v35  ;;  %v3528_v4 = vadd.f32 %v3527_v62, %v3452_v56  ;;  %v3460_v5 = vmul.f32 %v5423_v14, %v3374_v36 }
 0x39d   : > { %v3536_v3 = vadd.f32 %v3458_v61, %v3457_v15  ;;  %v3532_v51 = vadd.f32 %v3531_v63, %v3455_v58 }
 0x39e   : > { %3529 = vadd.xlane.f32.xlu1 %v3528_v4 }
 0x39f   : > { %v3533_v38 = vadd.f32 %v3532_v51, %v3456_v60  ;;  %v3537_v53 = vadd.f32 %v3536_v3, %v3459_v33 }
 0x3a1   : > { %3534 = vadd.xlane.f32.xlu0 %v3533_v38  ;;  %v3538_v20 = vadd.f32 %v3537_v53, %v3460_v5 }
 0x3a3   : > { %3539 = vadd.xlane.f32.xlu1 %v3538_v20 }
 0x3f8   : > { %v3465_v54 = vpop.xlane.xlu0 %3464 }
 0x3f9   : > { %v3548_v11 = vadd.f32 %v5542_v10, %v3465_v54 }
 0x3fb   : > { %v4047_v42 = vmul.f32 -1.442695, %v3548_v11 }
 0x3fc   : > { %v3470_v16 = vpop.xlane.xlu0 %3469 }
 0x3fd   : > { %4743 = vpow2.f32 %v4047_v42  ;;  %v3549_v59 = vadd.f32 %v5542_v10, %v3470_v16 }
 0x3ff   : > { %v4048_v52 = vmul.f32 -1.442695, %v3549_v59 }
 0x400   : > { %v3475_v12 = vpop.xlane.xlu1 %3474 }
 0x401   : > { %4745 = vpow2.f32 %v4048_v52  ;;  %v3550_v14 = vadd.f32 %v5542_v10, %v3475_v12 }
 0x403   : > { %v4049_v19 = vmul.f32 -1.442695, %v3550_v14 }
 0x404   : > { %v3480_v21 = vpop.xlane.xlu1 %3479 }
 0x405   : > { %4747 = vpow2.f32 %v4049_v19  ;;  %v3551_v49 = vadd.f32 %v5542_v10, %v3480_v21 }
 0x407   : > { %v4744_v22 = vpop.eup %4743  ;;  %v4050_v25 = vmul.f32 -1.442695, %v3551_v49 }
 0x408   : > { %v3612_v27 = vadd.f32 1.0, %v4744_v22  ;;  %v3485_v28 = vpop.xlane.xlu0 %3484 }
 0x409   : > { %4749 = vpow2.f32 %v4050_v25  ;;  %v3552_v29 = vadd.f32 %v5542_v10, %v3485_v28 }
 0x40a   : > { %4751 = vrcp.f32 %v3612_v27 }
 0x40b   : > { %v4746_v17 = vpop.eup %4745  ;;  %v4051_v57 = vmul.f32 -1.442695, %v3552_v29  ;;  %v3490_v30 = vpop.xlane.xlu1 %3489 }
 0x40c   : > { %v3613_v31 = vadd.f32 1.0, %v4746_v17  ;;  %v3553_v32 = vadd.f32 %v5542_v10, %v3490_v30 }
 0x40d   : > { %4753 = vpow2.f32 %v4051_v57 }
 0x40e   : > { %4755 = vrcp.f32 %v3613_v31  ;;  %v4052_v44 = vmul.f32 -1.442695, %v3553_v32 }
 0x40f   : > { %v4748_v18 = vpop.eup %4747 }
 0x410   : > { %v3614_v7 = vadd.f32 1.0, %v4748_v18  ;;  %4757 = vpow2.f32 %v4052_v44  ;;  %v3495_v1 = vpop.xlane.xlu0 %3494 }
 0x411   : > { %v3554_v34 = vadd.f32 %v5542_v10, %v3495_v1 }
 0x412   : > { %4759 = vrcp.f32 %v3614_v7 }
 0x413   : > { %v4750_v39 = vpop.eup %4749  ;;  %v4053_v43 = vmul.f32 -1.442695, %v3554_v34  ;;  %v3500_v8 = vpop.xlane.xlu1 %3499 }
 0x414   : > { %v4752_v45 = vpop.eup %4751  ;;  %v3615_v9 = vadd.f32 1.0, %v4750_v39  ;;  %v3555_v46 = vadd.f32 %v5542_v10, %v3500_v8 }
 0x415   : > { %3661 = vst.msk [vmem:[%s5556_s15] sm:$0xff] %vm3660_vm2, %v4752_v45  ;;  %4761 = vpow2.f32 %v4053_v43 }
 0x416   : > { %4763 = vrcp.f32 %v3615_v9  ;;  %v4054_v47 = vmul.f32 -1.442695, %v3555_v46 }
 0x417   : > { %v4754_v24 = vpop.eup %4753 }
 0x418   : > { %v4756_v2 = vpop.eup %4755  ;;  %v3616_v41 = vadd.f32 1.0, %v4754_v24  ;;  %4765 = vpow2.f32 %v4054_v47  ;;  %v3505_v48 = vpop.xlane.xlu0 %3504 }
 0x419   : > { %3662 = vst.msk [vmem:[%s5556_s15 + $0x8] sm:$0xff] %vm3660_vm2, %v4756_v2  ;;  %v3556_v37 = vadd.f32 %v5542_v10, %v3505_v48 }
 0x41a   : > { %v4758_v13 = vpop.eup %4757  ;;  %4767 = vrcp.f32 %v3616_v41 }
 0x41b   : > { %v3617_v55 = vadd.f32 1.0, %v4758_v13  ;;  %v4055_v40 = vmul.f32 -1.442695, %v3556_v37  ;;  %v3510_v23 = vpop.xlane.xlu1 %3509 }
 0x41c   : > { %v4760_v6 = vpop.eup %4759  ;;  %v3557_v26 = vadd.f32 %v5542_v10, %v3510_v23 }
 0x41d   : > { %3663 = vst.msk [vmem:[%s5556_s15 + $0x10] sm:$0xff] %vm3660_vm2, %v4760_v6  ;;  %4769 = vrcp.f32 %v3617_v55 }
 0x41e   : > { %4771 = vpow2.f32 %v4055_v40  ;;  %v4056_v0 = vmul.f32 -1.442695, %v3557_v26 }
 0x41f   : > { %v4762_v50 = vpop.eup %4761 }
 0x420   : > { %v4764_v56 = vpop.eup %4763  ;;  %v3618_v58 = vadd.f32 1.0, %v4762_v50  ;;  %4773 = vpow2.f32 %v4056_v0  ;;  %v3515_v15 = vpop.xlane.xlu0 %3514 }
 0x421   : > { %3664 = vst.msk [vmem:[%s5556_s15 + $0x18] sm:$0xff] %vm3660_vm2, %v4764_v56  ;;  %v3558_v35 = vadd.f32 %v5542_v10, %v3515_v15 }
 0x422   : > { %v4766_v63 = vpop.eup %4765  ;;  %4775 = vrcp.f32 %v3618_v58 }
 0x423   : > { %v3619_v61 = vadd.f32 1.0, %v4766_v63  ;;  %v4057_v36 = vmul.f32 -1.442695, %v3558_v35  ;;  %v3520_v62 = vpop.xlane.xlu1 %3519 }
 0x424   : > { %v4768_v60 = vpop.eup %4767  ;;  %v3559_v33 = vadd.f32 %v5542_v10, %v3520_v62 }
 0x425   : > { %3665 = vst.msk [vmem:[%s5556_s15 + $0x20] sm:$0xff] %vm3660_vm2, %v4768_v60  ;;  %4777 = vrcp.f32 %v3619_v61 }
 0x426   : > { %4779 = vpow2.f32 %v4057_v36  ;;  %v4058_v3 = vmul.f32 -1.442695, %v3559_v33 }
 0x427   : > { %v4770_v4 = vpop.eup %4769 }
 0x428   : > { %v4772_v51 = vpop.eup %4771  ;;  %3666 = vst.msk [vmem:[%s5556_s15 + $0x28] sm:$0xff] %vm3660_vm2, %v4770_v4  ;;  %4781 = vpow2.f32 %v4058_v3 }
 0x429   : > { %v3525_v5 = vpop.xlane.xlu0 %3524  ;;  %v3620_v38 = vadd.f32 1.0, %v4772_v51 }
 0x42a   : > { %v3560_v53 = vadd.f32 %v5542_v10, %v3525_v5  ;;  %v4774_v20 = vpop.eup %4773 }
 0x42b   : > { %4783 = vrcp.f32 %v3620_v38  ;;  %v3621_v54 = vadd.f32 1.0, %v4774_v20  ;;  %v3530_v42 = vpop.xlane.xlu1 %3529 }
 0x42c   : > { %v4059_v11 = vmul.f32 -1.442695, %v3560_v53  ;;  %v4776_v16 = vpop.eup %4775  ;;  %v3561_v59 = vadd.f32 %v5542_v10, %v3530_v42 }
 0x42d   : > { %3667 = vst.msk [vmem:[%s5556_s15 + $0x30] sm:$0xff] %vm3660_vm2, %v4776_v16  ;;  %4785 = vrcp.f32 %v3621_v54 }
 0x42e   : > { %v3535_v52 = vpop.xlane.xlu0 %3534  ;;  %4787 = vpow2.f32 %v4059_v11  ;;  %v4060_v12 = vmul.f32 -1.442695, %v3561_v59 }
 0x42f   : > { %v3562_v14 = vadd.f32 %v5542_v10, %v3535_v52  ;;  %v4778_v19 = vpop.eup %4777 }
 0x430   : > { %v3540_v21 = vpop.xlane.xlu1 %3539  ;;  %v4780_v49 = vpop.eup %4779  ;;  %3668 = vst.msk [vmem:[%s5556_s15 + $0x38] sm:$0xff] %vm3660_vm2, %v4778_v19  ;;  %4789 = vpow2.f32 %v4060_v12 }
 0x431   : > { %v4061_v22 = vmul.f32 -1.442695, %v3562_v14  ;;  %v3563_v25 = vadd.f32 %v5542_v10, %v3540_v21  ;;  %v3622_v27 = vadd.f32 1.0, %v4780_v49 }
 0x432   : > { %v4782_v28 = vpop.eup %4781 }
 0x433   : > { %4791 = vpow2.f32 %v4061_v22  ;;  %v4062_v29 = vmul.f32 -1.442695, %v3563_v25  ;;  %v3623_v17 = vadd.f32 1.0, %v4782_v28 }
 0x434   : > { %4793 = vrcp.f32 %v3622_v27 }
 0x435   : > { %4795 = vpow2.f32 %v4062_v29  ;;  %v4784_v57 = vpop.eup %4783 }
 0x436   : > { %4797 = vrcp.f32 %v3623_v17  ;;  %3669 = vst.msk [vmem:[%s5556_s15 + $0x40] sm:$0xff] %vm3660_vm2, %v4784_v57 }
 0x437   : > { %v4786_v30 = vpop.eup %4785 }
 0x438   : > { %v4788_v31 = vpop.eup %4787  ;;  %3670 = vst.msk [vmem:[%s5556_s15 + $0x48] sm:$0xff] %vm3660_vm2, %v4786_v30 }
 0x439   : > { %v3624_v32 = vadd.f32 1.0, %v4788_v31 }
 0x43a   : > { %v4790_v10 = vpop.eup %4789 }
 0x43b   : > { %4799 = vrcp.f32 %v3624_v32  ;;  %v3625_v44 = vadd.f32 1.0, %v4790_v10 }
 0x43d   : > { %v4792_v18 = vpop.eup %4791  ;;  %4801 = vrcp.f32 %v3625_v44 }
 0x43e   : > { %v4794_v7 = vpop.eup %4793  ;;  %v3626_v1 = vadd.f32 1.0, %v4792_v18 }
 0x43f   : > { %v4796_v34 = vpop.eup %4795  ;;  %3671 = vst.msk [vmem:[%s5556_s15 + $0x50] sm:$0xff] %vm3660_vm2, %v4794_v7 }
 0x440   : > { %v4798_v39 = vpop.eup %4797  ;;  %4803 = vrcp.f32 %v3626_v1  ;;  %v3627_v43 = vadd.f32 1.0, %v4796_v34 }
 0x441   : > { %3672 = vst.msk [vmem:[%s5556_s15 + $0x58] sm:$0xff] %vm3660_vm2, %v4798_v39 }
 0x442   : > { %4805 = vrcp.f32 %v3627_v43 }
 0x445   : > { %v4800_v8 = vpop.eup %4799 }
 0x446   : > { %3673 = vst.msk [vmem:[%s5556_s15 + $0x60] sm:$0xff] %vm3660_vm2, %v4800_v8 }
 0x447   : > { %v4802_v45 = vpop.eup %4801 }
 0x448   : > { %3674 = vst.msk [vmem:[%s5556_s15 + $0x68] sm:$0xff] %vm3660_vm2, %v4802_v45 }
 0x44a   : > { %v4804_v9 = vpop.eup %4803 }
 0x44b   : > { %3675 = vst.msk [vmem:[%s5556_s15 + $0x70] sm:$0xff] %vm3660_vm2, %v4804_v9 }
 0x44c   : > { %v4806_v46 = vpop.eup %4805 }
 0x44d   : > { %3676 = vst.msk [vmem:[%s5556_s15 + $0x78] sm:$0xff] %vm3660_vm2, %v4806_v46 }
 0x44e PF: > { %s23_s11 = sadd.s32 1, %s4877_s11  }
 0x44f   : > { %p20_p7 = scmp.ge.s32.totalorder %s23_s11, 4  }
 0x451   :  { %22 = sbr.rel (!%p20_p7) target bundleno = 5 (0x5), region = 95 }
 0x458   :  { %3699 = vsyncpa [#allocation4], 1 }
 0x459   :  { %3701 = vsyncpa [#allocation4 + $0x1], 1 }
 0x45a   :  { %3702 = vsyncpa [#allocation6], 1 }

</bundles_post_ra>
